<compile_context>
chip_gen: v7x
topology: tpu7x:2x2x1
jax: 0.10.0
libtpu: 0.0.40
codegen_flags: <defaults>
</compile_context>

<pallas_src>
import jax
import jax.numpy as jnp
from jax import lax
from jax.experimental import pallas as pl
from jax.experimental.pallas import tpu as pltpu


# ----------------------------------------------------------------------------
# Fused Pallas kernel: MaxPool2x2 -> Conv3x3+BN+LReLU -> Conv3x3+BN+LReLU
# ----------------------------------------------------------------------------
def _down_block_kernel(x_ref, w1_ref, s1_ref, b1_ref, w2_ref, s2_ref, b2_ref,
                       o_ref, xpad_ref, ypad_ref):
    # x_ref:   (bt*Hh, 2, Wh, 2*Cin)  bt images, pre-reshaped in the wrapper so
    #          the 2x2 pooling window maps to (dim 1, the two lane halves).
    # w1_ref:  (9*Cin,  Cout)         conv1 weights, 3x3 taps flattened into K
    # w2_ref:  (9*Cout, Cout)         conv2 weights
    # s*/b*:   (1, Cout)              folded BatchNorm scale / shift
    # o_ref:   (bt, Hh, Wh, Cout)
    # xpad_ref/ypad_ref: VMEM scratch holding the zero-padded conv inputs.
    bt, hh2, wh2, cin = xpad_ref.shape
    hh, wh = hh2 - 2, wh2 - 2
    cout = w1_ref.shape[1]

    # ---- MaxPool2d(2): entirely on VMEM-resident data -----------------------
    xv = x_ref[...]                                    # (bt*Hh, 2, Wh, 2*Cin)
    m = jnp.maximum(xv[:, 0], xv[:, 1])                # max over the 2 rows
    pooled = jnp.maximum(m[..., :cin], m[..., cin:])   # max over the 2 cols
    # pooled: (bt*Hh, Wh, Cin)

    def conv3x3_bn_lrelu(pad_ref, interior_4d, w_ref, s_ref, b_ref, ci):
        # Zero-pad (padding=1) into VMEM scratch, then in-kernel im2col:
        # the 9 shifted taps are concatenated along channels so the whole
        # 3x3 conv is ONE MXU matmul with K = 9*ci and M = bt*Hh*Wh rows.
        pad_ref[...] = jnp.zeros_like(pad_ref)
        pad_ref[:, 1:hh + 1, 1:wh + 1, :] = interior_4d
        taps = [pad_ref[:, dy:dy + hh, dx:dx + wh, :]
                for dy in range(3) for dx in range(3)]
        patches = jnp.concatenate(taps, axis=-1).reshape(bt * hh * wh, 9 * ci)
        y = jnp.dot(patches, w_ref[...], preferred_element_type=jnp.float32)
        y = y * s_ref[...] + b_ref[...]                # folded BatchNorm (f32)
        return jnp.where(y > 0, y, 0.01 * y)           # LeakyReLU(0.01)

    y1 = conv3x3_bn_lrelu(xpad_ref, pooled.reshape(bt, hh, wh, cin),
                          w1_ref, s1_ref, b1_ref, cin)
    # Dropout(p) in eval mode is the identity.
    y2 = conv3x3_bn_lrelu(ypad_ref, y1.reshape(bt, hh, wh, cout),
                          w2_ref, s2_ref, b2_ref, cout)
    o_ref[...] = y2.reshape(bt, hh, wh, cout).astype(o_ref.dtype)


# ----------------------------------------------------------------------------
# Helpers
# ----------------------------------------------------------------------------
def fold_bn(conv_bias, gamma, beta, running_mean, running_var, eps=1e-5):
    scale = gamma / jnp.sqrt(running_var + eps)
    shift = (conv_bias - running_mean) * scale + beta
    return scale, shift


def _pick_batch_tile(n, hh, wh, cin, cout, budget_bytes=8 << 20):
    """Largest divisor of n whose per-step VMEM footprint fits the budget."""
    # Rough per-image f32 footprint: padded scratches, double-buffered input /
    # output blocks, pooled tensor, im2col patches (both convs) and activations.
    per_img = 4 * (
        (hh + 2) * (wh + 2) * (cin + cout)          # pad scratches
        + 2 * (hh * 2 * wh * 2 * cin)               # input block (double-buffered)
        + 2 * (hh * wh * cout)                      # output block (double-buffered)
        + hh * wh * (cin + 9 * cin + 9 * cout + 2 * cout)
    )
    bt = max(1, min(n, budget_bytes // max(per_img, 1)))
    while n % bt != 0:
        bt -= 1
    return bt


# ----------------------------------------------------------------------------
# Wrapper (layout plumbing only: NCHW <-> NHWC, weight/tap flattening)
# ----------------------------------------------------------------------------
@jax.jit
def down_block_forward(x_nchw, params):
    """_DownBlock forward: MaxPool2d(2) -> ConvBNLReLU -> (Dropout=id) -> ConvBNLReLU."""
    n, cin, h, w = x_nchw.shape
    hh, wh = h // 2, w // 2
    cout = params["w1"].shape[-1]
    bt = _pick_batch_tile(n, hh, wh, cin, cout)

    s1, b1 = fold_bn(params["b1"], params["g1"], params["be1"],
                     params["m1"], params["v1"])
    s2, b2 = fold_bn(params["b2"], params["g2"], params["be2"],
                     params["m2"], params["v2"])

    # NCHW -> NHWC, then fold the 2x2 pooling window into (dim1, lane halves):
    # (N, H, W, C) -> (N*Hh, 2, Wh, 2*C); this reshape is contiguous (free).
    x_nhwc = jnp.transpose(x_nchw, (0, 2, 3, 1))
    x_r = x_nhwc.reshape(n * hh, 2, wh, 2 * cin).astype(jnp.float32)

    # HWIO (3,3,Ci,Co) -> (9*Ci, Co); tap order (ky, kx, ci) matches the
    # in-kernel concatenation order (dy, dx, c).
    w1 = params["w1"].reshape(9 * cin, cout).astype(jnp.float32)
    w2 = params["w2"].reshape(9 * cout, cout).astype(jnp.float32)
    s1r = s1.reshape(1, cout).astype(jnp.float32)
    b1r = b1.reshape(1, cout).astype(jnp.float32)
    s2r = s2.reshape(1, cout).astype(jnp.float32)
    b2r = b2.reshape(1, cout).astype(jnp.float32)

    out = pl.pallas_call(
        _down_block_kernel,
        out_shape=jax.ShapeDtypeStruct((n, hh, wh, cout), jnp.float32),
        grid=(n // bt,),
        in_specs=[
            pl.BlockSpec((bt * hh, 2, wh, 2 * cin), lambda i: (i, 0, 0, 0)),
            pl.BlockSpec((9 * cin, cout), lambda i: (0, 0)),
            pl.BlockSpec((1, cout), lambda i: (0, 0)),
            pl.BlockSpec((1, cout), lambda i: (0, 0)),
            pl.BlockSpec((9 * cout, cout), lambda i: (0, 0)),
            pl.BlockSpec((1, cout), lambda i: (0, 0)),
            pl.BlockSpec((1, cout), lambda i: (0, 0)),
        ],
        out_specs=pl.BlockSpec((bt, hh, wh, cout), lambda i: (i, 0, 0, 0)),
        scratch_shapes=[
            pltpu.VMEM((bt, hh + 2, wh + 2, cin), jnp.float32),   # padded pool out
            pltpu.VMEM((bt, hh + 2, wh + 2, cout), jnp.float32),  # padded conv1 out
        ],
        compiler_params=pltpu.CompilerParams(dimension_semantics=("parallel",)),
    )(x_r, w1, s1r, b1r, w2, s2r, b2r)

    return jnp.transpose(out, (0, 3, 1, 2))  # NHWC -> NCHW


# ----------------------------------------------------------------------------
# Pure-JAX reference (for correctness check only)
# ----------------------------------------------------------------------------
def reference_forward(x_nchw, params):
    x = jnp.transpose(x_nchw, (0, 2, 3, 1))
    x = lax.reduce_window(x, -jnp.inf, lax.max, (1, 2, 2, 1), (1, 2, 2, 1), "VALID")
    for w, cb, g, be, m, v in [
        (params["w1"], params["b1"], params["g1"], params["be1"], params["m1"], params["v1"]),
        (params["w2"], params["b2"], params["g2"], params["be2"], params["m2"], params["v2"]),
    ]:
        x = lax.conv_general_dilated(
            x, w, window_strides=(1, 1), padding="SAME",
            dimension_numbers=("NHWC", "HWIO", "NHWC"),
        )
        scale, shift = fold_bn(cb, g, be, m, v)
        x = x * scale + shift
        x = jnp.where(x > 0, x, 0.01 * x)
    return jnp.transpose(x, (0, 3, 1, 2))


# ----------------------------------------------------------------------------
# Main
# ----------------------------------------------------------------------------
if __name__ == "__main__":
    key = jax.random.PRNGKey(0)
    n, cin, hh, ww = 2, 4, 16, 16
    cout = 8
    # dropout_p = 0.1 (eval mode -> identity)

    ks = jax.random.split(key, 12)
    params = {
        # conv weights in HWIO layout (3, 3, Cin, Cout)
        "w1": 0.1 * jax.random.normal(ks[0], (3, 3, cin, cout), jnp.float32),
        "b1": 0.1 * jax.random.normal(ks[1], (cout,), jnp.float32),
        "g1": 1.0 + 0.1 * jax.random.normal(ks[2], (cout,), jnp.float32),
        "be1": 0.1 * jax.random.normal(ks[3], (cout,), jnp.float32),
        "m1": 0.1 * jax.random.normal(ks[4], (cout,), jnp.float32),
        "v1": 0.5 + jax.random.uniform(ks[5], (cout,), jnp.float32),
        "w2": 0.1 * jax.random.normal(ks[6], (3, 3, cout, cout), jnp.float32),
        "b2": 0.1 * jax.random.normal(ks[7], (cout,), jnp.float32),
        "g2": 1.0 + 0.1 * jax.random.normal(ks[8], (cout,), jnp.float32),
        "be2": 0.1 * jax.random.normal(ks[9], (cout,), jnp.float32),
        "m2": 0.1 * jax.random.normal(ks[10], (cout,), jnp.float32),
        "v2": 0.5 + jax.random.uniform(ks[11], (cout,), jnp.float32),
    }

    x = jax.random.normal(key, (n, cin, hh, ww), jnp.float32)

    out = down_block_forward(x, params)
    out = jax.block_until_ready(out)

    ref = jax.block_until_ready(reference_forward(x, params))
    assert out.shape == (n, cout, hh // 2, ww // 2), out.shape
    assert jnp.allclose(out, ref, atol=1e-4, rtol=1e-4), float(
        jnp.max(jnp.abs(out - ref))
    )

    print("KERNEL_OK")
</pallas_src>

<mosaic_0001>
module attributes {stable_mosaic.version = 11 : i64} {
  func.func @_down_block_kernel(%arg0: i32, %arg1: memref<16x2x8x8xf32, #tpu.memory_space<vmem>>, %arg2: memref<36x8xf32, #tpu.memory_space<vmem>>, %arg3: memref<1x8xf32, #tpu.memory_space<vmem>>, %arg4: memref<1x8xf32, #tpu.memory_space<vmem>>, %arg5: memref<72x8xf32, #tpu.memory_space<vmem>>, %arg6: memref<1x8xf32, #tpu.memory_space<vmem>>, %arg7: memref<1x8xf32, #tpu.memory_space<vmem>>, %arg8: memref<2x8x8x8xf32, #tpu.memory_space<vmem>>, %arg9: memref<2x10x10x4xf32, #tpu.memory_space<vmem>>, %arg10: memref<2x10x10x8xf32, #tpu.memory_space<vmem>>) attributes {dimension_semantics = [#tpu.dimension_semantics<parallel>], iteration_bounds = array<i64: 1>, scalar_prefetch = 0 : i64, scratch_operands = 2 : i64, tpu.core_type = #tpu.core_type<tc>, window_params = [{transform_indices = @transform_0, window_bounds = array<i64: 16, 2, 8, 8>}, {pipeline_mode = #tpu.pipeline_mode<synchronous>, transform_indices = @transform_1, window_bounds = array<i64: 36, 8>}, {pipeline_mode = #tpu.pipeline_mode<synchronous>, transform_indices = @transform_2, window_bounds = array<i64: 1, 8>}, {pipeline_mode = #tpu.pipeline_mode<synchronous>, transform_indices = @transform_3, window_bounds = array<i64: 1, 8>}, {pipeline_mode = #tpu.pipeline_mode<synchronous>, transform_indices = @transform_4, window_bounds = array<i64: 72, 8>}, {pipeline_mode = #tpu.pipeline_mode<synchronous>, transform_indices = @transform_5, window_bounds = array<i64: 1, 8>}, {pipeline_mode = #tpu.pipeline_mode<synchronous>, transform_indices = @transform_6, window_bounds = array<i64: 1, 8>}, {transform_indices = @transform_7, window_bounds = array<i64: 2, 8, 8, 8>}]} {
    %c0 = arith.constant 0 : index
    %c0_0 = arith.constant 0 : index
    %c0_1 = arith.constant 0 : index
    %c0_2 = arith.constant 0 : index
    %0 = vector.load %arg1[%c0, %c0_0, %c0_1, %c0_2] : memref<16x2x8x8xf32, #tpu.memory_space<vmem>>, vector<16x2x8x8xf32>
    %1 = vector.extract_strided_slice %0 {offsets = [0, 0, 0, 0], sizes = [16, 1, 8, 8], strides = [1, 1, 1, 1]} : vector<16x2x8x8xf32> to vector<16x1x8x8xf32>
    %2 = vector.shape_cast %1 : vector<16x1x8x8xf32> to vector<16x8x8xf32>
    %3 = vector.extract_strided_slice %0 {offsets = [0, 1, 0, 0], sizes = [16, 1, 8, 8], strides = [1, 1, 1, 1]} : vector<16x2x8x8xf32> to vector<16x1x8x8xf32>
    %4 = vector.shape_cast %3 : vector<16x1x8x8xf32> to vector<16x8x8xf32>
    %5 = arith.maximumf %2, %4 : vector<16x8x8xf32>
    %6 = vector.extract_strided_slice %5 {offsets = [0, 0, 0], sizes = [16, 8, 4], strides = [1, 1, 1]} : vector<16x8x8xf32> to vector<16x8x4xf32>
    %7 = vector.extract_strided_slice %5 {offsets = [0, 0, 4], sizes = [16, 8, 4], strides = [1, 1, 1]} : vector<16x8x8xf32> to vector<16x8x4xf32>
    %8 = arith.maximumf %6, %7 : vector<16x8x4xf32>
    %9 = vector.shape_cast %8 : vector<16x8x4xf32> to vector<2x8x8x4xf32>
    %cst = arith.constant 0.000000e+00 : f32
    %10 = vector.broadcast %cst : f32 to vector<2x10x10x4xf32>
    %c0_3 = arith.constant 0 : index
    %c0_4 = arith.constant 0 : index
    %c0_5 = arith.constant 0 : index
    %c0_6 = arith.constant 0 : index
    %11 = vector.load %arg9[%c0_3, %c0_4, %c0_5, %c0_6] : memref<2x10x10x4xf32, #tpu.memory_space<vmem>>, vector<2x10x10x4xf32>
    tpu.vector_store %arg9[%c0_3, %c0_4, %c0_5, %c0_6], %10 {strides = array<i32>} : memref<2x10x10x4xf32, #tpu.memory_space<vmem>>, vector<2x10x10x4xf32>,
    %c0_7 = arith.constant 0 : index
    %c1 = arith.constant 1 : index
    %c1_8 = arith.constant 1 : index
    %c0_9 = arith.constant 0 : index
    %12 = vector.load %arg9[%c0_7, %c1, %c1_8, %c0_9] : memref<2x10x10x4xf32, #tpu.memory_space<vmem>>, vector<2x8x8x4xf32>
    tpu.vector_store %arg9[%c0_7, %c1, %c1_8, %c0_9], %9 {strides = array<i32>} : memref<2x10x10x4xf32, #tpu.memory_space<vmem>>, vector<2x8x8x4xf32>,
    %c0_10 = arith.constant 0 : index
    %c0_11 = arith.constant 0 : index
    %c0_12 = arith.constant 0 : index
    %c0_13 = arith.constant 0 : index
    %13 = vector.load %arg9[%c0_10, %c0_11, %c0_12, %c0_13] : memref<2x10x10x4xf32, #tpu.memory_space<vmem>>, vector<2x8x8x4xf32>
    %c0_14 = arith.constant 0 : index
    %c0_15 = arith.constant 0 : index
    %c1_16 = arith.constant 1 : index
    %c0_17 = arith.constant 0 : index
    %14 = vector.load %arg9[%c0_14, %c0_15, %c1_16, %c0_17] : memref<2x10x10x4xf32, #tpu.memory_space<vmem>>, vector<2x8x8x4xf32>
    %c0_18 = arith.constant 0 : index
    %c0_19 = arith.constant 0 : index
    %c2 = arith.constant 2 : index
    %c0_20 = arith.constant 0 : index
    %15 = vector.load %arg9[%c0_18, %c0_19, %c2, %c0_20] : memref<2x10x10x4xf32, #tpu.memory_space<vmem>>, vector<2x8x8x4xf32>
    %c0_21 = arith.constant 0 : index
    %c1_22 = arith.constant 1 : index
    %c0_23 = arith.constant 0 : index
    %c0_24 = arith.constant 0 : index
    %16 = vector.load %arg9[%c0_21, %c1_22, %c0_23, %c0_24] : memref<2x10x10x4xf32, #tpu.memory_space<vmem>>, vector<2x8x8x4xf32>
    %c0_25 = arith.constant 0 : index
    %c1_26 = arith.constant 1 : index
    %c1_27 = arith.constant 1 : index
    %c0_28 = arith.constant 0 : index
    %17 = vector.load %arg9[%c0_25, %c1_26, %c1_27, %c0_28] : memref<2x10x10x4xf32, #tpu.memory_space<vmem>>, vector<2x8x8x4xf32>
    %c0_29 = arith.constant 0 : index
    %c1_30 = arith.constant 1 : index
    %c2_31 = arith.constant 2 : index
    %c0_32 = arith.constant 0 : index
    %18 = vector.load %arg9[%c0_29, %c1_30, %c2_31, %c0_32] : memref<2x10x10x4xf32, #tpu.memory_space<vmem>>, vector<2x8x8x4xf32>
    %c0_33 = arith.constant 0 : index
    %c2_34 = arith.constant 2 : index
    %c0_35 = arith.constant 0 : index
    %c0_36 = arith.constant 0 : index
    %19 = vector.load %arg9[%c0_33, %c2_34, %c0_35, %c0_36] : memref<2x10x10x4xf32, #tpu.memory_space<vmem>>, vector<2x8x8x4xf32>
    %c0_37 = arith.constant 0 : index
    %c2_38 = arith.constant 2 : index
    %c1_39 = arith.constant 1 : index
    %c0_40 = arith.constant 0 : index
    %20 = vector.load %arg9[%c0_37, %c2_38, %c1_39, %c0_40] : memref<2x10x10x4xf32, #tpu.memory_space<vmem>>, vector<2x8x8x4xf32>
    %c0_41 = arith.constant 0 : index
    %c2_42 = arith.constant 2 : index
    %c2_43 = arith.constant 2 : index
    %c0_44 = arith.constant 0 : index
    %21 = vector.load %arg9[%c0_41, %c2_42, %c2_43, %c0_44] : memref<2x10x10x4xf32, #tpu.memory_space<vmem>>, vector<2x8x8x4xf32>
    %22 = tpu.concatenate %13, %14, %15, %16, %17, %18, %19, %20, %21 in 3 : vector<2x8x8x4xf32>, vector<2x8x8x4xf32>, vector<2x8x8x4xf32>, vector<2x8x8x4xf32>, vector<2x8x8x4xf32>, vector<2x8x8x4xf32>, vector<2x8x8x4xf32>, vector<2x8x8x4xf32>, vector<2x8x8x4xf32> -> vector<2x8x8x36xf32>
    %23 = vector.shape_cast %22 : vector<2x8x8x36xf32> to vector<128x36xf32>
    %c0_45 = arith.constant 0 : index
    %c0_46 = arith.constant 0 : index
    %24 = vector.load %arg2[%c0_45, %c0_46] : memref<36x8xf32, #tpu.memory_space<vmem>>, vector<36x8xf32>
    %cst_47 = arith.constant dense<0.000000e+00> : vector<128x8xf32>
    %25 = tpu.matmul %23, %24, %cst_47 {dimension_numbers = #tpu.dot_dimension_numbers<[1], [0], [0], [1], [0, 0, 1, 1], [], []>} : vector<128x36xf32>, vector<36x8xf32>, vector<128x8xf32> -> vector<128x8xf32>
    %c0_48 = arith.constant 0 : index
    %c0_49 = arith.constant 0 : index
    %26 = vector.load %arg3[%c0_48, %c0_49] : memref<1x8xf32, #tpu.memory_space<vmem>>, vector<1x8xf32>
    %27 = vector.broadcast %26 : vector<1x8xf32> to vector<128x8xf32>
    %28 = arith.mulf %25, %27 : vector<128x8xf32>
    %c0_50 = arith.constant 0 : index
    %c0_51 = arith.constant 0 : index
    %29 = vector.load %arg4[%c0_50, %c0_51] : memref<1x8xf32, #tpu.memory_space<vmem>>, vector<1x8xf32>
    %30 = vector.broadcast %29 : vector<1x8xf32> to vector<128x8xf32>
    %31 = arith.addf %28, %30 : vector<128x8xf32>
    %cst_52 = arith.constant 0.000000e+00 : f32
    %32 = vector.broadcast %cst_52 : f32 to vector<128x8xf32>
    %33 = arith.cmpf ogt, %31, %32 : vector<128x8xf32>
    %cst_53 = arith.constant 0.00999999977 : f32
    %34 = vector.broadcast %cst_53 : f32 to vector<128x8xf32>
    %35 = arith.mulf %34, %31 : vector<128x8xf32>
    %36 = arith.select %33, %31, %35 : vector<128x8xi1>, vector<128x8xf32>
    %37 = vector.shape_cast %36 : vector<128x8xf32> to vector<2x8x8x8xf32>
    %cst_54 = arith.constant 0.000000e+00 : f32
    %38 = vector.broadcast %cst_54 : f32 to vector<2x10x10x8xf32>
    %c0_55 = arith.constant 0 : index
    %c0_56 = arith.constant 0 : index
    %c0_57 = arith.constant 0 : index
    %c0_58 = arith.constant 0 : index
    %39 = vector.load %arg10[%c0_55, %c0_56, %c0_57, %c0_58] : memref<2x10x10x8xf32, #tpu.memory_space<vmem>>, vector<2x10x10x8xf32>
    tpu.vector_store %arg10[%c0_55, %c0_56, %c0_57, %c0_58], %38 {strides = array<i32>} : memref<2x10x10x8xf32, #tpu.memory_space<vmem>>, vector<2x10x10x8xf32>,
    %c0_59 = arith.constant 0 : index
    %c1_60 = arith.constant 1 : index
    %c1_61 = arith.constant 1 : index
    %c0_62 = arith.constant 0 : index
    %40 = vector.load %arg10[%c0_59, %c1_60, %c1_61, %c0_62] : memref<2x10x10x8xf32, #tpu.memory_space<vmem>>, vector<2x8x8x8xf32>
    tpu.vector_store %arg10[%c0_59, %c1_60, %c1_61, %c0_62], %37 {strides = array<i32>} : memref<2x10x10x8xf32, #tpu.memory_space<vmem>>, vector<2x8x8x8xf32>,
    %c0_63 = arith.constant 0 : index
    %c0_64 = arith.constant 0 : index
    %c0_65 = arith.constant 0 : index
    %c0_66 = arith.constant 0 : index
    %41 = vector.load %arg10[%c0_63, %c0_64, %c0_65, %c0_66] : memref<2x10x10x8xf32, #tpu.memory_space<vmem>>, vector<2x8x8x8xf32>
    %c0_67 = arith.constant 0 : index
    %c0_68 = arith.constant 0 : index
    %c1_69 = arith.constant 1 : index
    %c0_70 = arith.constant 0 : index
    %42 = vector.load %arg10[%c0_67, %c0_68, %c1_69, %c0_70] : memref<2x10x10x8xf32, #tpu.memory_space<vmem>>, vector<2x8x8x8xf32>
    %c0_71 = arith.constant 0 : index
    %c0_72 = arith.constant 0 : index
    %c2_73 = arith.constant 2 : index
    %c0_74 = arith.constant 0 : index
    %43 = vector.load %arg10[%c0_71, %c0_72, %c2_73, %c0_74] : memref<2x10x10x8xf32, #tpu.memory_space<vmem>>, vector<2x8x8x8xf32>
    %c0_75 = arith.constant 0 : index
    %c1_76 = arith.constant 1 : index
    %c0_77 = arith.constant 0 : index
    %c0_78 = arith.constant 0 : index
    %44 = vector.load %arg10[%c0_75, %c1_76, %c0_77, %c0_78] : memref<2x10x10x8xf32, #tpu.memory_space<vmem>>, vector<2x8x8x8xf32>
    %c0_79 = arith.constant 0 : index
    %c1_80 = arith.constant 1 : index
    %c1_81 = arith.constant 1 : index
    %c0_82 = arith.constant 0 : index
    %45 = vector.load %arg10[%c0_79, %c1_80, %c1_81, %c0_82] : memref<2x10x10x8xf32, #tpu.memory_space<vmem>>, vector<2x8x8x8xf32>
    %c0_83 = arith.constant 0 : index
    %c1_84 = arith.constant 1 : index
    %c2_85 = arith.constant 2 : index
    %c0_86 = arith.constant 0 : index
    %46 = vector.load %arg10[%c0_83, %c1_84, %c2_85, %c0_86] : memref<2x10x10x8xf32, #tpu.memory_space<vmem>>, vector<2x8x8x8xf32>
    %c0_87 = arith.constant 0 : index
    %c2_88 = arith.constant 2 : index
    %c0_89 = arith.constant 0 : index
    %c0_90 = arith.constant 0 : index
    %47 = vector.load %arg10[%c0_87, %c2_88, %c0_89, %c0_90] : memref<2x10x10x8xf32, #tpu.memory_space<vmem>>, vector<2x8x8x8xf32>
    %c0_91 = arith.constant 0 : index
    %c2_92 = arith.constant 2 : index
    %c1_93 = arith.constant 1 : index
    %c0_94 = arith.constant 0 : index
    %48 = vector.load %arg10[%c0_91, %c2_92, %c1_93, %c0_94] : memref<2x10x10x8xf32, #tpu.memory_space<vmem>>, vector<2x8x8x8xf32>
    %c0_95 = arith.constant 0 : index
    %c2_96 = arith.constant 2 : index
    %c2_97 = arith.constant 2 : index
    %c0_98 = arith.constant 0 : index
    %49 = vector.load %arg10[%c0_95, %c2_96, %c2_97, %c0_98] : memref<2x10x10x8xf32, #tpu.memory_space<vmem>>, vector<2x8x8x8xf32>
    %50 = tpu.concatenate %41, %42, %43, %44, %45, %46, %47, %48, %49 in 3 : vector<2x8x8x8xf32>, vector<2x8x8x8xf32>, vector<2x8x8x8xf32>, vector<2x8x8x8xf32>, vector<2x8x8x8xf32>, vector<2x8x8x8xf32>, vector<2x8x8x8xf32>, vector<2x8x8x8xf32>, vector<2x8x8x8xf32> -> vector<2x8x8x72xf32>
    %51 = vector.shape_cast %50 : vector<2x8x8x72xf32> to vector<128x72xf32>
    %c0_99 = arith.constant 0 : index
    %c0_100 = arith.constant 0 : index
    %52 = vector.load %arg5[%c0_99, %c0_100] : memref<72x8xf32, #tpu.memory_space<vmem>>, vector<72x8xf32>
    %cst_101 = arith.constant dense<0.000000e+00> : vector<128x8xf32>
    %53 = tpu.matmul %51, %52, %cst_101 {dimension_numbers = #tpu.dot_dimension_numbers<[1], [0], [0], [1], [0, 0, 1, 1], [], []>} : vector<128x72xf32>, vector<72x8xf32>, vector<128x8xf32> -> vector<128x8xf32>
    %c0_102 = arith.constant 0 : index
    %c0_103 = arith.constant 0 : index
    %54 = vector.load %arg6[%c0_102, %c0_103] : memref<1x8xf32, #tpu.memory_space<vmem>>, vector<1x8xf32>
    %55 = vector.broadcast %54 : vector<1x8xf32> to vector<128x8xf32>
    %56 = arith.mulf %53, %55 : vector<128x8xf32>
    %c0_104 = arith.constant 0 : index
    %c0_105 = arith.constant 0 : index
    %57 = vector.load %arg7[%c0_104, %c0_105] : memref<1x8xf32, #tpu.memory_space<vmem>>, vector<1x8xf32>
    %58 = vector.broadcast %57 : vector<1x8xf32> to vector<128x8xf32>
    %59 = arith.addf %56, %58 : vector<128x8xf32>
    %cst_106 = arith.constant 0.000000e+00 : f32
    %60 = vector.broadcast %cst_106 : f32 to vector<128x8xf32>
    %61 = arith.cmpf ogt, %59, %60 : vector<128x8xf32>
    %cst_107 = arith.constant 0.00999999977 : f32
    %62 = vector.broadcast %cst_107 : f32 to vector<128x8xf32>
    %63 = arith.mulf %62, %59 : vector<128x8xf32>
    %64 = arith.select %61, %59, %63 : vector<128x8xi1>, vector<128x8xf32>
    %65 = vector.shape_cast %64 : vector<128x8xf32> to vector<2x8x8x8xf32>
    %c0_108 = arith.constant 0 : index
    %c0_109 = arith.constant 0 : index
    %c0_110 = arith.constant 0 : index
    %c0_111 = arith.constant 0 : index
    %66 = vector.load %arg8[%c0_108, %c0_109, %c0_110, %c0_111] : memref<2x8x8x8xf32, #tpu.memory_space<vmem>>, vector<2x8x8x8xf32>
    tpu.vector_store %arg8[%c0_108, %c0_109, %c0_110, %c0_111], %65 {strides = array<i32>} : memref<2x8x8x8xf32, #tpu.memory_space<vmem>>, vector<2x8x8x8xf32>,
    return
  }
  func.func @transform_0(%arg0: i32) -> (i32, i32, i32, i32) {
    %c0_i32 = arith.constant 0 : i32
    %c0_i32_0 = arith.constant 0 : i32
    %c0_i32_1 = arith.constant 0 : i32
    %c0_i32_2 = arith.constant 0 : i32
    return %arg0, %c0_i32, %c0_i32_0, %c0_i32_1 : i32, i32, i32, i32
  }
  func.func @transform_1(%arg0: i32) -> (i32, i32) {
    %c0_i32 = arith.constant 0 : i32
    %c0_i32_0 = arith.constant 0 : i32
    %c0_i32_1 = arith.constant 0 : i32
    return %c0_i32, %c0_i32_0 : i32, i32
  }
  func.func @transform_2(%arg0: i32) -> (i32, i32) {
    %c0_i32 = arith.constant 0 : i32
    %c0_i32_0 = arith.constant 0 : i32
    %c0_i32_1 = arith.constant 0 : i32
    return %c0_i32, %c0_i32_0 : i32, i32
  }
  func.func @transform_3(%arg0: i32) -> (i32, i32) {
    %c0_i32 = arith.constant 0 : i32
    %c0_i32_0 = arith.constant 0 : i32
    %c0_i32_1 = arith.constant 0 : i32
    return %c0_i32, %c0_i32_0 : i32, i32
  }
  func.func @transform_4(%arg0: i32) -> (i32, i32) {
    %c0_i32 = arith.constant 0 : i32
    %c0_i32_0 = arith.constant 0 : i32
    %c0_i32_1 = arith.constant 0 : i32
    return %c0_i32, %c0_i32_0 : i32, i32
  }
  func.func @transform_5(%arg0: i32) -> (i32, i32) {
    %c0_i32 = arith.constant 0 : i32
    %c0_i32_0 = arith.constant 0 : i32
    %c0_i32_1 = arith.constant 0 : i32
    return %c0_i32, %c0_i32_0 : i32, i32
  }
  func.func @transform_6(%arg0: i32) -> (i32, i32) {
    %c0_i32 = arith.constant 0 : i32
    %c0_i32_0 = arith.constant 0 : i32
    %c0_i32_1 = arith.constant 0 : i32
    return %c0_i32, %c0_i32_0 : i32, i32
  }
  func.func @transform_7(%arg0: i32) -> (i32, i32, i32, i32) {
    %c0_i32 = arith.constant 0 : i32
    %c0_i32_0 = arith.constant 0 : i32
    %c0_i32_1 = arith.constant 0 : i32
    %c0_i32_2 = arith.constant 0 : i32
    return %arg0, %c0_i32, %c0_i32_0, %c0_i32_1 : i32, i32, i32, i32
  }
}

</mosaic_0001>

<bundles_post_ra>
// kernel: down_block_forward.1
= control target key start
LH: loop header
LB: loop body
LE: loop exit
PB: predicated region body
PF: predicated region fallthrough
CT: control target
= control target key end

     0   :  { %vm154_vm0 = vcmask 31744   ;;  %vm156_vm1 = vcmask 25600   ;;  %v2674_v3 = vmov 0.0   ;;  %s2675_s17 = smov 124   ;;  %s2676_s22 = smov 4   ;;  %vm886_vm2 = vcmask 64512   ;;  %s4180_s0 = inlined_call_operand.vmem [shape: f32[16,2,8,8], index: 0, kind: input, shape index: {}]   ;;  %s4181_s1 = inlined_call_operand.vmem [shape: f32[36,8], index: 1, kind: input, shape index: {}]   ;;  %s4182_s2 = inlined_call_operand.vmem [shape: f32[1,8], index: 2, kind: input, shape index: {}]   ;;  %s4183_s3 = inlined_call_operand.vmem [shape: f32[1,8], index: 3, kind: input, shape index: {}]   ;;  %s4184_s4 = inlined_call_operand.vmem [shape: f32[72,8], index: 4, kind: input, shape index: {}]   ;;  %s4185_s5 = inlined_call_operand.vmem [shape: f32[1,8], index: 5, kind: input, shape index: {}]   ;;  %s4186_s6 = inlined_call_operand.vmem [shape: f32[1,8], index: 6, kind: input, shape index: {}]   ;;  %s4187_s7 = inlined_call_operand.vmem [shape: f32[2,8,8,8], index: 7, kind: output, shape index: {}]  }
   0x1   :  { %v26_v0 = vld [vmem:[%s4180_s0] sm:$0xff]  ;;  %v27_v1 = vld [vmem:[%s4180_s0 + $0x8] sm:$0xff]  ;;  %v28_v2 = vld [vmem:[%s4180_s0 + $0x10] sm:$0xff]  ;;  %158 = vst.msk [vmem:[#allocation2 + $0x10] sm:$0xff] %vm154_vm0, %v2674_v3  ;;  %s2679_s23 = smov 16   ;;  %s2680_s24 = smov 20  }
   0x2   :  { %159 = vst.msk [vmem:[#allocation2 + $0x18] sm:$0x3] %vm156_vm1, %v2674_v3  ;;  %157 = vst.msk [vmem:[#allocation2 + $0x8] sm:$0x3] %vm156_vm1, %v2674_v3  ;;  %v2817_v4 = vmax.f32 %v26_v0, %v27_v1  ;;  %v29_v5 = vld [vmem:[%s4180_s0 + $0x18] sm:$0xff]  ;;  %v30_v6 = vld [vmem:[%s4180_s0 + $0x20] sm:$0xff] }
   0x3   :  { %155 = vst.msk [vmem:[#allocation2] sm:$0xff] %vm154_vm0, %v2674_v3  ;;  %160 = vst.msk [vmem:[#allocation2 + $0x20] sm:$0xff] %vm154_vm0, %v2674_v3  ;;  %v31_v7 = vld [vmem:[%s4180_s0 + $0x28] sm:$0xff]  ;;  %v32_v9 = vld [vmem:[%s4180_s0 + $0x30] sm:$0xff]  ;;  %v2838_v11 = vmax.f32 %v28_v2, %v29_v5  ;;  %s2681_s29 = smov 24   ;;  %s2682_s11 = smov 28  }
   0x4   :  { %161 = vst.msk [vmem:[#allocation2 + $0x28] sm:$0x3] %vm156_vm1, %v2674_v3  ;;  %163 = vst.msk [vmem:[#allocation2 + $0x38] sm:$0x3] %vm156_vm1, %v2674_v3  ;;  %v2828_v8 = vmax.f32 %v30_v6, %v31_v7  ;;  %v33_v10 = vld [vmem:[%s4180_s0 + $0x38] sm:$0xff]  ;;  %90 = vrot.lane.b32.xlu0 %v2817_v4, %s2675_s17  ;;  %v34_v13 = vld [vmem:[%s4180_s0 + $0x40] sm:$0xff] }
   0x5   :  { %162 = vst.msk [vmem:[#allocation2 + $0x30] sm:$0xff] %vm154_vm0, %v2674_v3  ;;  %164 = vst.msk [vmem:[#allocation2 + $0x40] sm:$0xff] %vm154_vm0, %v2674_v3  ;;  %v2842_v12 = vmax.f32 %v32_v9, %v33_v10  ;;  %v35_v14 = vld [vmem:[%s4180_s0 + $0x48] sm:$0xff]  ;;  %v36_v15 = vld [vmem:[%s4180_s0 + $0x50] sm:$0xff]  ;;  %vm1059_vm3 = vcmask 1043456   ;;  %s2683_s14 = smov 32  }
   0x6   :  { %165 = vst.msk [vmem:[#allocation2 + $0x48] sm:$0x3] %vm156_vm1, %v2674_v3  ;;  %167 = vst.msk [vmem:[#allocation2 + $0x58] sm:$0x3] %vm156_vm1, %v2674_v3  ;;  %94 = vrot.lane.b32.xlu1 %v2828_v8, %s2675_s17  ;;  %v37_v16 = vld [vmem:[%s4180_s0 + $0x58] sm:$0xff]  ;;  %v2858_v17 = vmax.f32 %v34_v13, %v35_v14  ;;  %v38_v19 = vld [vmem:[%s4180_s0 + $0x60] sm:$0xff] }
   0x7   :  { %166 = vst.msk [vmem:[#allocation2 + $0x50] sm:$0xff] %vm154_vm0, %v2674_v3  ;;  %168 = vst.msk [vmem:[#allocation2 + $0x60] sm:$0xff] %vm154_vm0, %v2674_v3  ;;  %v2862_v18 = vmax.f32 %v36_v15, %v37_v16  ;;  %v39_v20 = vld [vmem:[%s4180_s0 + $0x68] sm:$0xff]  ;;  %v40_v21 = vld [vmem:[%s4180_s0 + $0x70] sm:$0xff]  ;;  %vm903_vm4 = vcmask 97280   ;;  %vm920_vm5 = vcmask 130048  }
   0x8   :  { %169 = vst.msk [vmem:[#allocation2 + $0x68] sm:$0x3] %vm156_vm1, %v2674_v3  ;;  %171 = vst.msk [vmem:[#allocation2 + $0x78] sm:$0x3] %vm156_vm1, %v2674_v3  ;;  %92 = vrot.lane.b32.xlu0 %v2838_v11, %s2675_s17  ;;  %v41_v22 = vld [vmem:[%s4180_s0 + $0x78] sm:$0xff]  ;;  %v2878_v23 = vmax.f32 %v38_v19, %v39_v20  ;;  %v42_v25 = vld [vmem:[%s4180_s0 + $0x80] sm:$0xff] }
   0x9   :  { %170 = vst.msk [vmem:[#allocation2 + $0x70] sm:$0xff] %vm154_vm0, %v2674_v3  ;;  %172 = vst.msk [vmem:[#allocation2 + $0x80] sm:$0xff] %vm154_vm0, %v2674_v3  ;;  %v2882_v24 = vmax.f32 %v40_v21, %v41_v22  ;;  %v43_v26 = vld [vmem:[%s4180_s0 + $0x88] sm:$0xff]  ;;  %v44_v27 = vld [vmem:[%s4180_s0 + $0x90] sm:$0xff]  ;;  %vm937_vm6 = vcmask 162816   ;;  %vm954_vm7 = vcmask 195584  }
   0xa   :  { %173 = vst.msk [vmem:[#allocation2 + $0x88] sm:$0x3] %vm156_vm1, %v2674_v3  ;;  %175 = vst.msk [vmem:[#allocation2 + $0x98] sm:$0x3] %vm156_vm1, %v2674_v3  ;;  %96 = vrot.lane.b32.xlu1 %v2842_v12, %s2675_s17  ;;  %v45_v28 = vld [vmem:[%s4180_s0 + $0x98] sm:$0xff]  ;;  %v2898_v29 = vmax.f32 %v42_v25, %v43_v26  ;;  %v46_v30 = vld [vmem:[%s4180_s0 + $0xa0] sm:$0xff] }
   0xb   :  { %174 = vst.msk [vmem:[#allocation2 + $0x90] sm:$0xff] %vm154_vm0, %v2674_v3  ;;  %176 = vst.msk [vmem:[#allocation2 + $0xa0] sm:$0xff] %vm154_vm0, %v2674_v3  ;;  %v47_v31 = vld [vmem:[%s4180_s0 + $0xa8] sm:$0xff]  ;;  %v2908_v32 = vmax.f32 %v44_v27, %v45_v28  ;;  %v48_v33 = vld [vmem:[%s4180_s0 + $0xb0] sm:$0xff]  ;;  %vm971_vm8 = vcmask 228352   ;;  %vm988_vm9 = vcmask 261120  }
   0xc   :  { %177 = vst.msk [vmem:[#allocation2 + $0xa8] sm:$0x3] %vm156_vm1, %v2674_v3  ;;  %179 = vst.msk [vmem:[#allocation2 + $0xb8] sm:$0x3] %vm156_vm1, %v2674_v3  ;;  %98 = vrot.lane.b32.xlu0 %v2858_v17, %s2675_s17  ;;  %v49_v34 = vld [vmem:[%s4180_s0 + $0xb8] sm:$0xff]  ;;  %v2918_v35 = vmax.f32 %v46_v30, %v47_v31  ;;  %v50_v36 = vld [vmem:[%s4180_s0 + $0xc0] sm:$0xff] }
   0xd   :  { %178 = vst.msk [vmem:[#allocation2 + $0xb0] sm:$0xff] %vm154_vm0, %v2674_v3  ;;  %180 = vst.msk [vmem:[#allocation2 + $0xc0] sm:$0xff] %vm154_vm0, %v2674_v3  ;;  %v51_v37 = vld [vmem:[%s4180_s0 + $0xc8] sm:$0xff]  ;;  %v2928_v38 = vmax.f32 %v48_v33, %v49_v34  ;;  %v52_v39 = vld [vmem:[%s4180_s0 + $0xd0] sm:$0xff]  ;;  %vm1010_vm10 = vcmask 293888   ;;  %vm1303_vm11 = vcmask 58368  }
   0xe   :  { %181 = vst.msk [vmem:[#allocation2 + $0xc8] sm:$0x3] %vm156_vm1, %v2674_v3  ;;  %183 = vst.msk [vmem:[#allocation2 + $0xd8] sm:$0x3] %vm156_vm1, %v2674_v3  ;;  %100 = vrot.lane.b32.xlu1 %v2862_v18, %s2675_s17  ;;  %v53_v40 = vld [vmem:[%s4180_s0 + $0xd8] sm:$0xff]  ;;  %v2938_v41 = vmax.f32 %v50_v36, %v51_v37  ;;  %v54_v42 = vld [vmem:[%s4180_s0 + $0xe0] sm:$0xff] }
   0xf   :  { %182 = vst.msk [vmem:[#allocation2 + $0xd0] sm:$0xff] %vm154_vm0, %v2674_v3  ;;  %184 = vst.msk [vmem:[#allocation2 + $0xe0] sm:$0xff] %vm154_vm0, %v2674_v3  ;;  %v55_v43 = vld [vmem:[%s4180_s0 + $0xe8] sm:$0xff]  ;;  %v2948_v44 = vmax.f32 %v52_v39, %v53_v40  ;;  %v56_v45 = vld [vmem:[%s4180_s0 + $0xf0] sm:$0xff]  ;;  %s2685_s15 = smov 56   ;;  %s2686_s16 = smov 64  }
  0x10   :  { %185 = vst.msk [vmem:[#allocation2 + $0xe8] sm:$0x3] %vm156_vm1, %v2674_v3  ;;  %187 = vst.msk [vmem:[#allocation2 + $0xf8] sm:$0x3] %vm156_vm1, %v2674_v3  ;;  %102 = vrot.lane.b32.xlu0 %v2878_v23, %s2675_s17  ;;  %v57_v46 = vld [vmem:[%s4180_s0 + $0xf8] sm:$0xff]  ;;  %v2958_v47 = vmax.f32 %v54_v42, %v55_v43  ;;  %v229_v49 = vld [vmem:[#allocation2 + $0x1] sm:$0xff] }
  0x11   :  { %186 = vst.msk [vmem:[#allocation2 + $0xf0] sm:$0xff] %vm154_vm0, %v2674_v3  ;;  %188 = vst.msk [vmem:[#allocation2 + $0x100] sm:$0xff] %vm154_vm0, %v2674_v3  ;;  %v2962_v48 = vmax.f32 %v56_v45, %v57_v46  ;;  %v245_v50 = vld [vmem:[#allocation2 + $0x2] sm:$0xff]  ;;  %s2677_s0 = smov 8   ;;  %v1007_v33 = vld [vmem:[%s4181_s1 + $0x10] sm:$0xff] }
  0x12   :  { %189 = vst.msk [vmem:[#allocation2 + $0x108] sm:$0x3] %vm156_vm1, %v2674_v3  ;;  %191 = vst.msk [vmem:[#allocation2 + $0x118] sm:$0x3] %vm156_vm1, %v2674_v3  ;;  %104 = vrot.lane.b32.xlu1 %v2882_v24, %s2675_s17  ;;  %v1006_v30 = vld [vmem:[%s4181_s1 + $0x8] sm:$0xff]  ;;  %v1008_v34 = vld [vmem:[%s4181_s1 + $0x18] sm:$0xff] }
  0x13   :  { %190 = vst.msk [vmem:[#allocation2 + $0x110] sm:$0xff] %vm154_vm0, %v2674_v3  ;;  %192 = vst.msk [vmem:[#allocation2 + $0x120] sm:$0xff] %vm154_vm0, %v2674_v3  ;;  %v1009_v36 = vld [vmem:[%s4181_s1 + $0x20] sm:$0xf] }
  0x14   :  { %193 = vst.msk [vmem:[#allocation2 + $0x128] sm:$0x3] %vm156_vm1, %v2674_v3  ;;  %195 = vst.msk [vmem:[#allocation2 + $0x138] sm:$0x3] %vm156_vm1, %v2674_v3  ;;  %106 = vrot.lane.b32.xlu0 %v2898_v29, %s2675_s17 }
  0x15   :  { %194 = vst.msk [vmem:[#allocation2 + $0x130] sm:$0xff] %vm154_vm0, %v2674_v3 }
  0x16   :  { %108 = vrot.lane.b32.xlu1 %v2908_v32, %s2675_s17  ;;  %1302 = vst.msk [vmem:[#allocation3] sm:$0xff] %vm886_vm2, %v2674_v3  ;;  %1305 = vst.msk [vmem:[#allocation3 + $0x10] sm:$0xff] %vm886_vm2, %v2674_v3 }
  0x17   :  { %1307 = vst.msk [vmem:[#allocation3 + $0x20] sm:$0xff] %vm886_vm2, %v2674_v3  ;;  %1309 = vst.msk [vmem:[#allocation3 + $0x30] sm:$0xff] %vm886_vm2, %v2674_v3 }
  0x18   :  { %110 = vrot.lane.b32.xlu0 %v2918_v35, %s2675_s17  ;;  %1311 = vst.msk [vmem:[#allocation3 + $0x40] sm:$0xff] %vm886_vm2, %v2674_v3  ;;  %1313 = vst.msk [vmem:[#allocation3 + $0x50] sm:$0xff] %vm886_vm2, %v2674_v3 }
  0x19   :  { %1315 = vst.msk [vmem:[#allocation3 + $0x60] sm:$0xff] %vm886_vm2, %v2674_v3  ;;  %1317 = vst.msk [vmem:[#allocation3 + $0x70] sm:$0xff] %vm886_vm2, %v2674_v3 }
  0x1a   :  { %112 = vrot.lane.b32.xlu1 %v2928_v38, %s2675_s17  ;;  %1319 = vst.msk [vmem:[#allocation3 + $0x80] sm:$0xff] %vm886_vm2, %v2674_v3  ;;  %1321 = vst.msk [vmem:[#allocation3 + $0x90] sm:$0xff] %vm886_vm2, %v2674_v3 }
  0x1b   :  { %1323 = vst.msk [vmem:[#allocation3 + $0xa0] sm:$0xff] %vm886_vm2, %v2674_v3  ;;  %1325 = vst.msk [vmem:[#allocation3 + $0xb0] sm:$0xff] %vm886_vm2, %v2674_v3 }
  0x1c   :  { %114 = vrot.lane.b32.xlu0 %v2938_v41, %s2675_s17  ;;  %1327 = vst.msk [vmem:[#allocation3 + $0xc0] sm:$0xff] %vm886_vm2, %v2674_v3  ;;  %1329 = vst.msk [vmem:[#allocation3 + $0xd0] sm:$0xff] %vm886_vm2, %v2674_v3 }
  0x1d   :  { %1331 = vst.msk [vmem:[#allocation3 + $0xe0] sm:$0xff] %vm886_vm2, %v2674_v3  ;;  %1333 = vst.msk [vmem:[#allocation3 + $0xf0] sm:$0xff] %vm886_vm2, %v2674_v3 }
  0x1e   :  { %116 = vrot.lane.b32.xlu1 %v2948_v44, %s2675_s17  ;;  %1335 = vst.msk [vmem:[#allocation3 + $0x100] sm:$0xff] %vm886_vm2, %v2674_v3  ;;  %1337 = vst.msk [vmem:[#allocation3 + $0x110] sm:$0xff] %vm886_vm2, %v2674_v3 }
  0x1f   :  { %1339 = vst.msk [vmem:[#allocation3 + $0x120] sm:$0xff] %vm886_vm2, %v2674_v3  ;;  %1341 = vst.msk [vmem:[#allocation3 + $0x130] sm:$0xff] %vm886_vm2, %v2674_v3 }
  0x20   :  { %118 = vrot.lane.b32.xlu0 %v2958_v47, %s2675_s17  ;;  %1308 = vst.msk [vmem:[#allocation3 + $0x28] sm:$0x3] %vm1303_vm11, %v2674_v3  ;;  %1304 = vst.msk [vmem:[#allocation3 + $0x8] sm:$0x3] %vm1303_vm11, %v2674_v3 }
  0x21   :  { %1306 = vst.msk [vmem:[#allocation3 + $0x18] sm:$0x3] %vm1303_vm11, %v2674_v3  ;;  %1310 = vst.msk [vmem:[#allocation3 + $0x38] sm:$0x3] %vm1303_vm11, %v2674_v3 }
  0x22   :  { %120 = vrot.lane.b32.xlu1 %v2962_v48, %s2675_s17  ;;  %s2678_s17 = smov 12   ;;  %1312 = vst.msk [vmem:[#allocation3 + $0x48] sm:$0x3] %vm1303_vm11, %v2674_v3  ;;  %1314 = vst.msk [vmem:[#allocation3 + $0x58] sm:$0x3] %vm1303_vm11, %v2674_v3 }
  0x23   :  { %1316 = vst.msk [vmem:[#allocation3 + $0x68] sm:$0x3] %vm1303_vm11, %v2674_v3  ;;  %1318 = vst.msk [vmem:[#allocation3 + $0x78] sm:$0x3] %vm1303_vm11, %v2674_v3 }
  0x24   :  { %374 = vrot.lane.b32.xlu0 %v229_v49, %s2676_s22  ;;  %v237_v49 = vld [vmem:[#allocation2 + $0xa1] sm:$0xff]  ;;  %1320 = vst.msk [vmem:[#allocation3 + $0x88] sm:$0x3] %vm1303_vm11, %v2674_v3  ;;  %1322 = vst.msk [vmem:[#allocation3 + $0x98] sm:$0x3] %vm1303_vm11, %v2674_v3 }
  0x25   :  { %1324 = vst.msk [vmem:[#allocation3 + $0xa8] sm:$0x3] %vm1303_vm11, %v2674_v3  ;;  %1326 = vst.msk [vmem:[#allocation3 + $0xb8] sm:$0x3] %vm1303_vm11, %v2674_v3 }
  0x26   :  { %1328 = vst.msk [vmem:[#allocation3 + $0xc8] sm:$0x3] %vm1303_vm11, %v2674_v3  ;;  %1330 = vst.msk [vmem:[#allocation3 + $0xd8] sm:$0x3] %vm1303_vm11, %v2674_v3 }
  0x27   :  { %1332 = vst.msk [vmem:[#allocation3 + $0xe8] sm:$0x3] %vm1303_vm11, %v2674_v3  ;;  %1334 = vst.msk [vmem:[#allocation3 + $0xf8] sm:$0x3] %vm1303_vm11, %v2674_v3 }
  0x28   :  { %438 = vrot.lane.b32.xlu0 %v245_v50, %s2677_s0  ;;  %1336 = vst.msk [vmem:[#allocation3 + $0x108] sm:$0x3] %vm1303_vm11, %v2674_v3  ;;  %1338 = vst.msk [vmem:[#allocation3 + $0x118] sm:$0x3] %vm1303_vm11, %v2674_v3 }
  0x29   :  { %1340 = vst.msk [vmem:[#allocation3 + $0x128] sm:$0x3] %vm1303_vm11, %v2674_v3  ;;  %1342 = vst.msk [vmem:[#allocation3 + $0x138] sm:$0x3] %vm1303_vm11, %v2674_v3 }
  0x76   :  { %v91_v51 = vpop.permute.xlu0 %90 }
  0x77   :  { %v138_v52 = vmax.f32 %v2817_v4, %v91_v51 }
  0x78   :  { %v95_v53 = vpop.permute.xlu1 %94 }
  0x79   :  { %v140_v54 = vmax.f32 %v2828_v8, %v95_v53  ;;  %197 = vst.msk [vmem:[#allocation2 + $0x11] sm:$0xff] %vm154_vm0, %v138_v52 }
  0x7a   :  { %v93_v55 = vpop.permute.xlu0 %92 }
  0x7b   :  { %199 = vst.msk [vmem:[#allocation2 + $0x31] sm:$0xff] %vm154_vm0, %v140_v54  ;;  %v139_v56 = vmax.f32 %v2838_v11, %v93_v55  ;;  %v253_v55 = vld [vmem:[#allocation2 + $0xa2] sm:$0xff] }
  0x7c   :  { %v97_v57 = vpop.permute.xlu1 %96 }
  0x7d   :  { %v141_v58 = vmax.f32 %v2842_v12, %v97_v57  ;;  %198 = vst.msk [vmem:[#allocation2 + $0x21] sm:$0xff] %vm154_vm0, %v139_v56 }
  0x7e   :  { %v99_v59 = vpop.permute.xlu0 %98 }
  0x7f   :  { %200 = vst.msk [vmem:[#allocation2 + $0x41] sm:$0xff] %vm154_vm0, %v141_v58  ;;  %v142_v60 = vmax.f32 %v2858_v17, %v99_v59  ;;  %v317_v59 = vld [vmem:[#allocation2 + $0x90] sm:$0xff] }
  0x80   :  { %v101_v61 = vpop.permute.xlu1 %100  ;;  %v3019_v62 = vld [vmem:[#allocation2 + $0x10] sm:$0xff] }
  0x81   :  { %v230_v63 = vld [vmem:[#allocation2 + $0x11] sm:$0xff]  ;;  %v143_v0 = vmax.f32 %v2862_v18, %v101_v61  ;;  %502 = vrot.lane.b32.xlu0 %v3019_v62, %s2678_s17  ;;  %201 = vst.msk [vmem:[#allocation2 + $0x51] sm:$0xff] %vm154_vm0, %v142_v60 }
  0x82   :  { %376 = vrot.lane.b32.xlu1 %v230_v63, %s2676_s22  ;;  %v103_v1 = vpop.permute.xlu0 %102  ;;  %v246_v5 = vld [vmem:[#allocation2 + $0x12] sm:$0xff] }
  0x83   :  { %202 = vst.msk [vmem:[#allocation2 + $0x61] sm:$0xff] %vm154_vm0, %v143_v0  ;;  %v144_v2 = vmax.f32 %v2878_v23, %v103_v1  ;;  %v232_v13 = vld [vmem:[#allocation2 + $0x31] sm:$0xff] }
  0x84   :  { %v105_v4 = vpop.permute.xlu1 %104  ;;  %v278_v7 = vld [vmem:[#allocation2 + $0x21] sm:$0xff]  ;;  %v248_v23 = vld [vmem:[#allocation2 + $0x32] sm:$0xff] }
  0x85   :  { %v145_v6 = vmax.f32 %v2882_v24, %v105_v4  ;;  %566 = vrot.lane.b32.xlu0 %v230_v63, %s2679_s23  ;;  %203 = vst.msk [vmem:[#allocation2 + $0x71] sm:$0xff] %vm154_vm0, %v144_v2  ;;  %v3032_v8 = vld [vmem:[#allocation2 + $0x20] sm:$0xff]  ;;  %v3060_v28 = vld [vmem:[#allocation2 + $0x30] sm:$0xff] }
  0x86   :  { %440 = vrot.lane.b32.xlu1 %v246_v5, %s2677_s0  ;;  %v107_v9 = vpop.permute.xlu0 %106  ;;  %v294_v21 = vld [vmem:[#allocation2 + $0x22] sm:$0xff]  ;;  %v333_v4 = vld [vmem:[#allocation2 + $0x91] sm:$0xff] }
  0x87   :  { %204 = vst.msk [vmem:[#allocation2 + $0x81] sm:$0xff] %vm154_vm0, %v145_v6  ;;  %v146_v10 = vmax.f32 %v2898_v29, %v107_v9  ;;  %v1005_v29 = vld [vmem:[%s4181_s1] sm:$0xff]  ;;  %s2684_s1 = smov 48  }
  0x88   :  { %v109_v11 = vpop.permute.xlu1 %108  ;;  %v2625_v31 = vpack.c.bf16 %v1006_v30, %v1005_v29  ;;  %v233_v37 = vld [vmem:[#allocation2 + $0x41] sm:$0xff]  ;;  %v250_v40 = vld [vmem:[#allocation2 + $0x52] sm:$0xff] }
  0x89   :  { %v147_v12 = vmax.f32 %v2908_v32, %v109_v11  ;;  %568 = vrot.lane.b32.xlu0 %v278_v7, %s2679_s23  ;;  %205 = vst.msk [vmem:[#allocation2 + $0xb1] sm:$0xff] %vm154_vm0, %v146_v10  ;;  %v3072_v32 = vld [vmem:[#allocation2 + $0x40] sm:$0xff] }
  0x8a   :  { %504 = vrot.lane.b32.xlu1 %v3032_v8, %s2678_s17  ;;  %v111_v14 = vpop.permute.xlu0 %110  ;;  %2626 = vmatprep.subr.bf16.mxu0 %v2625_v31  ;;  %v296_v39 = vld [vmem:[#allocation2 + $0x42] sm:$0xff] }
  0x8b   :  { %206 = vst.msk [vmem:[#allocation2 + $0xc1] sm:$0xff] %vm154_vm0, %v147_v12  ;;  %v148_v15 = vmax.f32 %v2918_v35, %v111_v14  ;;  %2628 = vmatpush3.bf16.msra.mxu0 %v2625_v31  ;;  %v2629_v35 = vpack.c.bf16 %v1008_v34, %v1007_v33  ;;  %v3105_v42 = vld [vmem:[#allocation2 + $0x60] sm:$0xff] }
  0x8c   :  { %v113_v16 = vpop.permute.xlu1 %112  ;;  %v235_v43 = vld [vmem:[#allocation2 + $0x61] sm:$0xff]  ;;  %v252_v46 = vld [vmem:[#allocation2 + $0x72] sm:$0xff] }
  0x8d   :  { %v149_v17 = vmax.f32 %v2928_v38, %v113_v16  ;;  %380 = vrot.lane.b32.xlu0 %v232_v13, %s2676_s22  ;;  %207 = vst.msk [vmem:[#allocation2 + $0xd1] sm:$0xff] %vm154_vm0, %v148_v15  ;;  %2630 = vmatprep.subr.bf16.mxu0 %v2629_v35  ;;  %v234_v38 = vld [vmem:[#allocation2 + $0x51] sm:$0xff]  ;;  %v298_v45 = vld [vmem:[#allocation2 + $0x62] sm:$0xff] }
  0x8e   :  { %378 = vrot.lane.b32.xlu1 %v278_v7, %s2676_s22  ;;  %v115_v18 = vpop.permute.xlu0 %114  ;;  %v284_v52 = vld [vmem:[#allocation2 + $0x81] sm:$0xff] }
  0x8f   :  { %208 = vst.msk [vmem:[#allocation2 + $0xe1] sm:$0xff] %vm154_vm0, %v149_v17  ;;  %v150_v19 = vmax.f32 %v2938_v41, %v115_v18  ;;  %2632 = vmatpush3.bf16.msra.mxu0 %v2629_v35  ;;  %v3099_v41 = vld [vmem:[#allocation2 + $0x50] sm:$0xff]  ;;  %v300_v54 = vld [vmem:[#allocation2 + $0x82] sm:$0xff] }
  0x90   :  { %v117_v20 = vpop.permute.xlu1 %116  ;;  %2557 = vmatprep.subr.msk.mxu0 %vm1059_vm3, %v1009_v36  ;;  %v238_v51 = vld [vmem:[#allocation2 + $0xb1] sm:$0xff]  ;;  %v213_v16 = vld [vmem:[#allocation2] sm:$0xff] }
  0x91   :  { %v151_v22 = vmax.f32 %v2948_v44, %v117_v20  ;;  %632 = vrot.lane.b32.xlu0 %v294_v21, %s2680_s24  ;;  %209 = vst.msk [vmem:[#allocation2 + $0xf1] sm:$0xff] %vm154_vm0, %v150_v19  ;;  %v236_v44 = vld [vmem:[#allocation2 + $0x71] sm:$0xff] }
  0x92   :  { %630 = vrot.lane.b32.xlu1 %v246_v5, %s2680_s24  ;;  %v119_v24 = vpop.permute.xlu0 %118  ;;  %v254_v58 = vld [vmem:[#allocation2 + $0xb2] sm:$0xff]  ;;  %v3156_v2 = vld [vmem:[#allocation2 + $0xc0] sm:$0xff] }
  0x93   :  { %210 = vst.msk [vmem:[#allocation2 + $0x101] sm:$0xff] %vm154_vm0, %v151_v22  ;;  %v152_v25 = vmax.f32 %v2958_v47, %v119_v24  ;;  %2558 = vmatpush3.msk.msra.mxu0 %vm1059_vm3, %v1009_v36  ;;  %v3123_v47 = vld [vmem:[#allocation2 + $0x70] sm:$0xff]  ;;  %v239_v10 = vld [vmem:[#allocation2 + $0xc1] sm:$0xff] }
  0x94   :  { %v121_v26 = vpop.permute.xlu1 %120  ;;  %v3154_v1 = vld [vmem:[#allocation2 + $0xb0] sm:$0xff]  ;;  %v302_v20 = vld [vmem:[#allocation2 + $0xc2] sm:$0xff] }
  0x95   :  { %v153_v27 = vmax.f32 %v2962_v48, %v121_v26  ;;  %444 = vrot.lane.b32.xlu0 %v248_v23, %s2677_s0  ;;  %211 = vst.msk [vmem:[#allocation2 + $0x111] sm:$0xff] %vm154_vm0, %v152_v25  ;;  %v268_v48 = vld [vmem:[#allocation2 + $0x80] sm:$0xff]  ;;  %v240_v15 = vld [vmem:[#allocation2 + $0xd1] sm:$0xff] }
  0x96   :  { %442 = vrot.lane.b32.xlu1 %v294_v21, %s2677_s0  ;;  %v375_v50 = vpop.permute.xlu0 %374  ;;  %v349_v17 = vld [vmem:[#allocation2 + $0x92] sm:$0xff] }
  0x97   :  { %212 = vst.msk [vmem:[#allocation2 + $0x121] sm:$0xff] %vm154_vm0, %v153_v27  ;;  %v256_v25 = vld [vmem:[#allocation2 + $0xd2] sm:$0xff] }
  0x98   :  { %v3192_v31 = vld [vmem:[#allocation2 + $0xd0] sm:$0xff] }
  0x99   :  { %696 = vrot.lane.b32.xlu0 %v3060_v28, %s2681_s29 }
  0x9a   :  { %694 = vrot.lane.b32.xlu1 %v3032_v8, %s2681_s29  ;;  %v439_v53 = vpop.permute.xlu0 %438 }
  0x9d   :  { %508 = vrot.lane.b32.xlu0 %v3072_v32, %s2678_s17 }
  0x9e   :  { %506 = vrot.lane.b32.xlu1 %v3060_v28, %s2678_s17 }
  0xa1   :  { %760 = vrot.lane.b32.xlu0 %v232_v13, %s2682_s11 }
  0xa2   :  { %758 = vrot.lane.b32.xlu1 %v278_v7, %s2682_s11 }
  0xa5   :  { %382 = vrot.lane.b32.xlu0 %v233_v37, %s2676_s22 }
  0xa6   :  { %570 = vrot.lane.b32.xlu1 %v232_v13, %s2679_s23 }
  0xa9   :  { %634 = vrot.lane.b32.xlu0 %v248_v23, %s2680_s24 }
  0xaa   :  { %822 = vrot.lane.b32.xlu1 %v294_v21, %s2683_s14  ;;  %v870_v21 = vsel %vm154_vm0, %v213_v16, %v375_v50 }
  0xab   :  { %v887_v24 = vsel %vm886_vm2, %v870_v21, %v439_v53 }
  0xad   :  { %384 = vrot.lane.b32.xlu0 %v234_v38, %s2676_s22 }
  0xae   :  { %572 = vrot.lane.b32.xlu1 %v233_v37, %s2679_s23 }
  0xb1   :  { %636 = vrot.lane.b32.xlu0 %v296_v39, %s2680_s24 }
  0xb2   :  { %824 = vrot.lane.b32.xlu1 %v248_v23, %s2683_s14 }
  0xb5   :  { %448 = vrot.lane.b32.xlu0 %v250_v40, %s2677_s0 }
  0xb6   :  { %446 = vrot.lane.b32.xlu1 %v296_v39, %s2677_s0 }
  0xb9   :  { %700 = vrot.lane.b32.xlu0 %v3099_v41, %s2681_s29 }
  0xba   :  { %698 = vrot.lane.b32.xlu1 %v3072_v32, %s2681_s29 }
  0xbd   :  { %512 = vrot.lane.b32.xlu0 %v3105_v42, %s2678_s17 }
  0xbe   :  { %510 = vrot.lane.b32.xlu1 %v3099_v41, %s2678_s17 }
  0xc1   :  { %764 = vrot.lane.b32.xlu0 %v234_v38, %s2682_s11 }
  0xc2   :  { %762 = vrot.lane.b32.xlu1 %v233_v37, %s2682_s11 }
  0xc5   :  { %386 = vrot.lane.b32.xlu0 %v235_v43, %s2676_s22 }
  0xc6   :  { %574 = vrot.lane.b32.xlu1 %v234_v38, %s2679_s23 }
  0xc9   :  { %638 = vrot.lane.b32.xlu0 %v250_v40, %s2680_s24 }
  0xca   :  { %826 = vrot.lane.b32.xlu1 %v296_v39, %s2683_s14 }
  0xcd   :  { %388 = vrot.lane.b32.xlu0 %v236_v44, %s2676_s22 }
  0xce   :  { %576 = vrot.lane.b32.xlu1 %v235_v43, %s2679_s23 }
  0xd1   :  { %640 = vrot.lane.b32.xlu0 %v298_v45, %s2680_s24 }
  0xd2   :  { %828 = vrot.lane.b32.xlu1 %v250_v40, %s2683_s14  ;;  %v3206_v40 = vld [vmem:[#allocation2 + $0xe0] sm:$0xff] }
  0xd5   :  { %452 = vrot.lane.b32.xlu0 %v252_v46, %s2677_s0 }
  0xd6   :  { %450 = vrot.lane.b32.xlu1 %v298_v45, %s2677_s0 }
  0xd9   :  { %704 = vrot.lane.b32.xlu0 %v3123_v47, %s2681_s29 }
  0xda   :  { %702 = vrot.lane.b32.xlu1 %v3105_v42, %s2681_s29 }
  0xdd   :  { %516 = vrot.lane.b32.xlu0 %v268_v48, %s2678_s17 }
  0xde   :  { %514 = vrot.lane.b32.xlu1 %v3123_v47, %s2678_s17 }
  0xe1   :  { %768 = vrot.lane.b32.xlu0 %v236_v44, %s2682_s11 }
  0xe2   :  { %766 = vrot.lane.b32.xlu1 %v235_v43, %s2682_s11 }
  0xe5   :  { %390 = vrot.lane.b32.xlu0 %v237_v49, %s2676_s22 }
  0xe6   :  { %578 = vrot.lane.b32.xlu1 %v236_v44, %s2679_s23 }
  0xe9   :  { %642 = vrot.lane.b32.xlu0 %v252_v46, %s2680_s24 }
  0xea   :  { %830 = vrot.lane.b32.xlu1 %v298_v45, %s2683_s14 }
  0xed   :  { %392 = vrot.lane.b32.xlu0 %v238_v51, %s2676_s22 }
  0xee   :  { %580 = vrot.lane.b32.xlu1 %v284_v52, %s2679_s23 }
  0xf1   :  { %644 = vrot.lane.b32.xlu0 %v300_v54, %s2680_s24 }
  0xf2   :  { %832 = vrot.lane.b32.xlu1 %v252_v46, %s2683_s14 }
  0xf3   :  { %v503_v57 = vpop.permute.xlu0 %502 }
  0xf4   :  { %v3142_v56 = vpop.permute.xlu1 %376  ;;  %v904_v26 = vsel %vm903_vm4, %v887_v24, %v503_v57 }
  0xf5   :  { %456 = vrot.lane.b32.xlu0 %v254_v58, %s2677_s0  ;;  %v871_v35 = vsel %vm154_vm0, %v3019_v62, %v3142_v56 }
  0xf6   :  { %454 = vrot.lane.b32.xlu1 %v253_v55, %s2677_s0 }
  0xf7   :  { %v567_v61 = vpop.permute.xlu0 %566 }
  0xf8   :  { %v3146_v60 = vpop.permute.xlu1 %440  ;;  %v921_v30 = vsel %vm920_vm5, %v904_v26, %v567_v61 }
  0xf9   :  { %708 = vrot.lane.b32.xlu0 %v317_v59, %s2681_s29  ;;  %v888_v39 = vsel %vm886_vm2, %v871_v35, %v3146_v60  ;;  %v242_v59 = vld [vmem:[#allocation2 + $0xf1] sm:$0xff] }
  0xfa   :  { %706 = vrot.lane.b32.xlu1 %v268_v48, %s2681_s29 }
  0xfb   :  { %v3152_v0 = vpop.permute.xlu0 %568 }
  0xfc   :  { %v3150_v63 = vpop.permute.xlu1 %504 }
  0xfd   :  { %520 = vrot.lane.b32.xlu0 %v3156_v2, %s2678_s17  ;;  %v905_v44 = vsel %vm903_vm4, %v888_v39, %v3150_v63  ;;  %v304_v63 = vld [vmem:[#allocation2 + $0xe2] sm:$0xff] }
  0xfe   :  { %518 = vrot.lane.b32.xlu1 %v3154_v1, %s2678_s17  ;;  %v922_v46 = vsel %vm920_vm5, %v905_v44, %v3152_v0 }
  0xff   :  { %v3164_v6 = vpop.permute.xlu0 %380 }
 0x100   :  { %v3162_v5 = vpop.permute.xlu1 %378 }
 0x101   :  { %772 = vrot.lane.b32.xlu0 %v333_v4, %s2682_s11 }
 0x102   :  { %770 = vrot.lane.b32.xlu1 %v284_v52, %s2682_s11 }
 0x103   :  { %v633_v9 = vpop.permute.xlu0 %632 }
 0x104   :  { %v631_v7 = vpop.permute.xlu1 %630  ;;  %v939_v48 = vsel %vm937_vm6, %v922_v46, %v633_v9  ;;  %v872_v9 = vsel %vm154_vm0, %v3032_v8, %v3162_v5  ;;  %v306_v46 = vld [vmem:[#allocation2 + $0x102] sm:$0xff] }
 0x105   :  { %394 = vrot.lane.b32.xlu0 %v239_v10, %s2676_s22  ;;  %v938_v33 = vsel %vm937_vm6, %v921_v30, %v631_v7  ;;  %v258_v7 = vld [vmem:[#allocation2 + $0xf2] sm:$0xff] }
 0x106   :  { %582 = vrot.lane.b32.xlu1 %v238_v51, %s2679_s23 }
 0x107   :  { %v3172_v12 = vpop.permute.xlu0 %444 }
 0x108   :  { %v3170_v11 = vpop.permute.xlu1 %442 }
 0x109   :  { %646 = vrot.lane.b32.xlu0 %v254_v58, %s2680_s24 }
 0x10a   :  { %834 = vrot.lane.b32.xlu1 %v300_v54, %s2683_s14  ;;  %v241_v54 = vld [vmem:[#allocation2 + $0xe1] sm:$0xff] }
 0x10b   :  { %v697_v14 = vpop.permute.xlu0 %696 }
 0x10c   :  { %v695_v13 = vpop.permute.xlu1 %694  ;;  %v956_v49 = vsel %vm954_vm7, %v939_v48, %v697_v14 }
 0x10d   :  { %396 = vrot.lane.b32.xlu0 %v240_v15, %s2676_s22  ;;  %v955_v34 = vsel %vm954_vm7, %v938_v33, %v695_v13 }
 0x10e   :  { %584 = vrot.lane.b32.xlu1 %v239_v10, %s2679_s23 }
 0x10f   :  { %v3180_v19 = vpop.permute.xlu0 %508 }
 0x110   :  { %v3178_v18 = vpop.permute.xlu1 %506 }
 0x111   :  { %648 = vrot.lane.b32.xlu0 %v302_v20, %s2680_s24 }
 0x112   :  { %836 = vrot.lane.b32.xlu1 %v349_v17, %s2683_s14  ;;  %v3255_v17 = vld [vmem:[#allocation2 + $0xf0] sm:$0xff] }
 0x113   :  { %v761_v23 = vpop.permute.xlu0 %760 }
 0x114   :  { %v759_v22 = vpop.permute.xlu1 %758  ;;  %v973_v50 = vsel %vm971_vm8, %v956_v49, %v761_v23  ;;  %v873_v23 = vsel %vm154_vm0, %v3060_v28, %v3164_v6 }
 0x115   :  { %460 = vrot.lane.b32.xlu0 %v256_v25, %s2677_s0  ;;  %v972_v36 = vsel %vm971_vm8, %v955_v34, %v759_v22  ;;  %v3265_v22 = vld [vmem:[#allocation2 + $0x100] sm:$0xff]  ;;  %v890_v24 = vsel %vm886_vm2, %v873_v23, %v3172_v12 }
 0x116   :  { %458 = vrot.lane.b32.xlu1 %v302_v20, %s2677_s0 }
 0x117   :  { %v3189_v29 = vpop.permute.xlu0 %382 }
 0x118   :  { %v571_v27 = vpop.permute.xlu1 %570 }
 0x119   :  { %712 = vrot.lane.b32.xlu0 %v3192_v31, %s2681_s29 }
 0x11a   :  { %710 = vrot.lane.b32.xlu1 %v3156_v2, %s2681_s29 }
 0x11b   :  { %v635_v38 = vpop.permute.xlu0 %634 }
 0x11c   :  { %v823_v37 = vpop.permute.xlu1 %822 }
 0x11d   :  { %v989_v43 = vsel %vm988_vm9, %v972_v36, %v823_v37  ;;  %524 = vrot.lane.b32.xlu0 %v3206_v40, %s2678_s17 }
 0x11e   :  { %522 = vrot.lane.b32.xlu1 %v3192_v31, %s2678_s17  ;;  %2559 = vmatprep.mubr.msk.f32.mxu0 %vm1010_vm10, %v989_v43  ;;  %v244_v43 = vld [vmem:[#allocation2 + $0x111] sm:$0xff] }
 0x11f   :  { %v3216_v45 = vpop.permute.xlu0 %384 }
 0x120   :  { %v573_v62 = vpop.permute.xlu1 %572 }
 0x121   :  { %776 = vrot.lane.b32.xlu0 %v240_v15, %s2682_s11 }
 0x122   :  { %774 = vrot.lane.b32.xlu1 %v239_v10, %s2682_s11  ;;  %v889_v10 = vsel %vm886_vm2, %v872_v9, %v3170_v11 }
 0x123   :  { %v637_v52 = vpop.permute.xlu0 %636  ;;  %v906_v13 = vsel %vm903_vm4, %v889_v10, %v3178_v18 }
 0x124   :  { %v825_v51 = vpop.permute.xlu1 %824  ;;  %v923_v16 = vsel %vm920_vm5, %v906_v13, %v571_v27 }
 0x125   :  { %v990_v53 = vsel %vm988_vm9, %v973_v50, %v825_v51  ;;  %398 = vrot.lane.b32.xlu0 %v241_v54, %s2676_s22  ;;  %v260_v50 = vld [vmem:[#allocation2 + $0x112] sm:$0xff]  ;;  %v874_v51 = vsel %vm154_vm0, %v3072_v32, %v3189_v29 }
 0x126   :  { %586 = vrot.lane.b32.xlu1 %v240_v15, %s2679_s23  ;;  %2560 = vmatmul.mubr.msk.f32.vlgmr.msra.gmra.mrb[0].mxu0 %vm1010_vm10, %v990_v53 }
 0x127   :  { %v3231_v56 = vpop.permute.xlu0 %448 }
 0x128   :  { %v3229_v55 = vpop.permute.xlu1 %446 }
 0x129   :  { %650 = vrot.lane.b32.xlu0 %v256_v25, %s2680_s24 }
 0x12a   :  { %838 = vrot.lane.b32.xlu1 %v302_v20, %s2683_s14  ;;  %v940_v20 = vsel %vm937_vm6, %v923_v16, %v635_v38 }
 0x12b   :  { %v701_v58 = vpop.permute.xlu0 %700 }
 0x12c   :  { %v699_v57 = vpop.permute.xlu1 %698 }
 0x12d   :  { %400 = vrot.lane.b32.xlu0 %v242_v59, %s2676_s22  ;;  %v957_v8 = vsel %vm954_vm7, %v940_v20, %v699_v57 }
 0x12e   :  { %588 = vrot.lane.b32.xlu1 %v241_v54, %s2679_s23 }
 0x12f   :  { %v3239_v61 = vpop.permute.xlu0 %512 }
 0x130   :  { %v3237_v60 = vpop.permute.xlu1 %510 }
 0x131   :  { %652 = vrot.lane.b32.xlu0 %v304_v63, %s2680_s24 }
 0x132   :  { %840 = vrot.lane.b32.xlu1 %v256_v25, %s2683_s14  ;;  %v907_v25 = vsel %vm903_vm4, %v890_v24, %v3180_v19  ;;  %v243_v19 = vld [vmem:[#allocation2 + $0x101] sm:$0xff] }
 0x133   :  { %v765_v4 = vpop.permute.xlu0 %764  ;;  %v924_v30 = vsel %vm920_vm5, %v907_v25, %v573_v62 }
 0x134   :  { %v763_v0 = vpop.permute.xlu1 %762  ;;  %v941_v28 = vsel %vm937_vm6, %v924_v30, %v637_v52  ;;  %v891_v52 = vsel %vm886_vm2, %v874_v51, %v3229_v55  ;;  %v325_v30 = vld [vmem:[#allocation2 + $0x130] sm:$0xff] }
 0x135   :  { %464 = vrot.lane.b32.xlu0 %v258_v7, %s2677_s0  ;;  %v974_v5 = vsel %vm971_vm8, %v957_v8, %v763_v0  ;;  %v958_v6 = vsel %vm954_vm7, %v941_v28, %v701_v58  ;;  %v908_v53 = vsel %vm903_vm4, %v891_v52, %v3237_v60  ;;  %v1400_v52 = vld [vmem:[#allocation3 + $0xa2] sm:$0xff] }
 0x136   :  { %462 = vrot.lane.b32.xlu1 %v304_v63, %s2677_s0  ;;  %v975_v12 = vsel %vm971_vm8, %v958_v6, %v765_v4  ;;  %v276_v4 = vld [vmem:[#allocation2 + $0x120] sm:$0xff] }
 0x137   :  { %v3252_v15 = vpop.permute.xlu0 %386 }
 0x138   :  { %v575_v14 = vpop.permute.xlu1 %574 }
 0x139   :  { %716 = vrot.lane.b32.xlu0 %v3255_v17, %s2681_s29  ;;  %v925_v58 = vsel %vm920_vm5, %v908_v53, %v575_v14 }
 0x13a   :  { %714 = vrot.lane.b32.xlu1 %v3206_v40, %s2681_s29 }
 0x13b   :  { %v639_v18 = vpop.permute.xlu0 %638 }
 0x13c   :  { %v827_v11 = vpop.permute.xlu1 %826  ;;  %v942_v32 = vsel %vm937_vm6, %v925_v58, %v639_v18 }
 0x13d   :  { %v991_v21 = vsel %vm988_vm9, %v974_v5, %v827_v11  ;;  %528 = vrot.lane.b32.xlu0 %v3265_v22, %s2678_s17  ;;  %v292_v5 = vld [vmem:[#allocation2 + $0x121] sm:$0xff] }
 0x13e   :  { %526 = vrot.lane.b32.xlu1 %v3255_v17, %s2678_s17  ;;  %2562 = vmatprep.mubr.msk.f32.mxu0 %vm1010_vm10, %v991_v21 }
 0x13f   :  { %v3279_v27 = vpop.permute.xlu0 %388 }
 0x140   :  { %v577_v26 = vpop.permute.xlu1 %576 }
 0x141   :  { %780 = vrot.lane.b32.xlu0 %v242_v59, %s2682_s11 }
 0x142   :  { %778 = vrot.lane.b32.xlu1 %v241_v54, %s2682_s11 }
 0x143   :  { %v641_v34 = vpop.permute.xlu0 %640 }
 0x144   :  { %v829_v33 = vpop.permute.xlu1 %828 }
 0x145   :  { %v992_v35 = vsel %vm988_vm9, %v975_v12, %v829_v33  ;;  %402 = vrot.lane.b32.xlu0 %v243_v19, %s2676_s22  ;;  %v876_v12 = vsel %vm154_vm0, %v3105_v42, %v3252_v15 }
 0x146   :  { %590 = vrot.lane.b32.xlu1 %v242_v59, %s2679_s23  ;;  %2563 = vmatmul.mubr.msk.f32.gmra.mrb[2].mxu0 %vm1010_vm10, %v992_v35  ;;  %v3319_v59 = vld [vmem:[#allocation2 + $0x110] sm:$0xff] }
 0x147   :  { %v3293_v37 = vpop.permute.xlu0 %452 }
 0x148   :  { %v3291_v36 = vpop.permute.xlu1 %450 }
 0x149   :  { %654 = vrot.lane.b32.xlu0 %v258_v7, %s2680_s24  ;;  %v893_v33 = vsel %vm886_vm2, %v876_v12, %v3291_v36  ;;  %v357_v36 = vld [vmem:[#allocation2 + $0x132] sm:$0xff] }
 0x14a   :  { %842 = vrot.lane.b32.xlu1 %v304_v63, %s2683_s14 }
 0x14b   :  { %v705_v39 = vpop.permute.xlu0 %704 }
 0x14c   :  { %v703_v38 = vpop.permute.xlu1 %702 }
 0x14d   :  { %404 = vrot.lane.b32.xlu0 %v244_v43, %s2676_s22  ;;  %v959_v29 = vsel %vm954_vm7, %v942_v32, %v703_v38 }
 0x14e   :  { %592 = vrot.lane.b32.xlu1 %v243_v19, %s2679_s23 }
 0x14f   :  { %v3301_v62 = vpop.permute.xlu0 %516 }
 0x150   :  { %v3299_v44 = vpop.permute.xlu1 %514 }
 0x151   :  { %656 = vrot.lane.b32.xlu0 %v306_v46, %s2680_s24  ;;  %v910_v35 = vsel %vm903_vm4, %v893_v33, %v3299_v44 }
 0x152   :  { %844 = vrot.lane.b32.xlu1 %v258_v7, %s2683_s14  ;;  %v875_v7 = vsel %vm154_vm0, %v3099_v41, %v3216_v45 }
 0x153   :  { %v769_v49 = vpop.permute.xlu0 %768  ;;  %v892_v9 = vsel %vm886_vm2, %v875_v7, %v3231_v56 }
 0x154   :  { %v767_v48 = vpop.permute.xlu1 %766  ;;  %v909_v10 = vsel %vm903_vm4, %v892_v9, %v3239_v61 }
 0x155   :  { %468 = vrot.lane.b32.xlu0 %v260_v50, %s2677_s0  ;;  %v976_v55 = vsel %vm971_vm8, %v959_v29, %v767_v48  ;;  %v926_v16 = vsel %vm920_vm5, %v909_v10, %v577_v26  ;;  %v308_v26 = vld [vmem:[#allocation2 + $0x122] sm:$0xff]  ;;  %v1496_v29 = vld [vmem:[#allocation3 + $0x92] sm:$0xff] }
 0x156   :  { %466 = vrot.lane.b32.xlu1 %v306_v46, %s2677_s0  ;;  %v943_v41 = vsel %vm937_vm6, %v926_v16, %v641_v34  ;;  %v341_v34 = vld [vmem:[#allocation2 + $0x131] sm:$0xff] }
 0x157   :  { %v3316_v57 = vpop.permute.xlu0 %390  ;;  %v960_v45 = vsel %vm954_vm7, %v943_v41, %v705_v39  ;;  %v1384_v39 = vld [vmem:[#allocation3 + $0xa1] sm:$0xff] }
 0x158   :  { %v3314_v54 = vpop.permute.xlu1 %578  ;;  %v977_v56 = vsel %vm971_vm8, %v960_v45, %v769_v49  ;;  %v1464_v49 = vld [vmem:[#allocation3 + $0x90] sm:$0xff]  ;;  %v221_v45 = vld [vmem:[#allocation2 + $0xa0] sm:$0xff] }
 0x159   :  { %720 = vrot.lane.b32.xlu0 %v3319_v59, %s2681_s29  ;;  %v927_v38 = vsel %vm920_vm5, %v910_v35, %v3314_v54 }
 0x15a   :  { %718 = vrot.lane.b32.xlu1 %v3265_v22, %s2681_s29 }
 0x15b   :  { %v3328_v63 = vpop.permute.xlu0 %642 }
 0x15c   :  { %v831_v60 = vpop.permute.xlu1 %830  ;;  %v944_v42 = vsel %vm937_vm6, %v927_v38, %v3328_v63  ;;  %v1376_v63 = vld [vmem:[#allocation3 + $0x1] sm:$0xff] }
 0x15d   :  { %v993_v0 = vsel %vm988_vm9, %v976_v55, %v831_v60  ;;  %532 = vrot.lane.b32.xlu0 %v276_v4, %s2678_s17 }
 0x15e   :  { %530 = vrot.lane.b32.xlu1 %v3319_v59, %s2678_s17  ;;  %2565 = vmatprep.mubr.msk.f32.mxu0 %vm1010_vm10, %v993_v0 }
 0x15f   :  { %v3344_v14 = vpop.permute.xlu0 %392 }
 0x160   :  { %v3342_v13 = vpop.permute.xlu1 %580 }
 0x161   :  { %784 = vrot.lane.b32.xlu0 %v244_v43, %s2682_s11 }
 0x162   :  { %782 = vrot.lane.b32.xlu1 %v243_v19, %s2682_s11 }
 0x163   :  { %v3352_v8 = vpop.permute.xlu0 %644 }
 0x164   :  { %v833_v20 = vpop.permute.xlu1 %832 }
 0x165   :  { %v994_v61 = vsel %vm988_vm9, %v977_v56, %v833_v20  ;;  %596 = vrot.lane.b32.xlu0 %v292_v5, %s2679_s23 }
 0x166   :  { %594 = vrot.lane.b32.xlu1 %v244_v43, %s2679_s23  ;;  %2566 = vmatmul.mubr.msk.f32.gmra.mrb[4].mxu0 %vm1010_vm10, %v994_v61 }
 0x167   :  { %v3360_v18 = vpop.permute.xlu0 %456 }
 0x168   :  { %v3358_v11 = vpop.permute.xlu1 %454 }
 0x169   :  { %848 = vrot.lane.b32.xlu0 %v260_v50, %s2683_s14 }
 0x16a   :  { %846 = vrot.lane.b32.xlu1 %v306_v46, %s2683_s14 }
 0x16b   :  { %v3364_v23 = vpop.permute.xlu0 %708 }
 0x16c   :  { %v707_v21 = vpop.permute.xlu1 %706 }
 0x16d   :  { %722 = vrot.lane.b32.xlu0 %v276_v4, %s2681_s29  ;;  %v961_v15 = vsel %vm954_vm7, %v944_v42, %v707_v21  ;;  %v1392_v4 = vld [vmem:[#allocation3 + $0x2] sm:$0xff] }
 0x16e   :  { %658 = vrot.lane.b32.xlu1 %v260_v50, %s2680_s24  ;;  %v877_v50 = vsel %vm154_vm0, %v3123_v47, %v3279_v27  ;;  %v1480_v27 = vld [vmem:[#allocation3 + $0x91] sm:$0xff] }
 0x16f   :  { %v3370_v25 = vpop.permute.xlu0 %520  ;;  %v894_v51 = vsel %vm886_vm2, %v877_v50, %v3293_v37 }
 0x170   :  { %v3368_v24 = vpop.permute.xlu1 %518  ;;  %v911_v53 = vsel %vm903_vm4, %v894_v51, %v3301_v62 }
 0x171   :  { %786 = vrot.lane.b32.xlu0 %v292_v5, %s2682_s11  ;;  %v928_v47 = vsel %vm920_vm5, %v911_v53, %v3342_v13 }
 0x172   :  { %660 = vrot.lane.b32.xlu1 %v308_v26, %s2680_s24  ;;  %v945_v32 = vsel %vm937_vm6, %v928_v47, %v3352_v8  ;;  %v878_v8 = vsel %vm154_vm0, %v221_v45, %v3316_v57 }
 0x173   :  { %v773_v6 = vpop.permute.xlu0 %772  ;;  %v962_v37 = vsel %vm954_vm7, %v945_v32, %v3364_v23  ;;  %v895_v61 = vsel %vm886_vm2, %v878_v8, %v3358_v11  ;;  %v879_v11 = vsel %vm154_vm0, %v3154_v1, %v3344_v14 }
 0x174   :  { %v771_v28 = vpop.permute.xlu1 %770  ;;  %v979_v62 = vsel %vm971_vm8, %v962_v37, %v773_v6  ;;  %v912_v5 = vsel %vm903_vm4, %v895_v61, %v3368_v24  ;;  %v896_v24 = vsel %vm886_vm2, %v879_v11, %v3360_v18 }
 0x175   :  { %850 = vrot.lane.b32.xlu0 %v308_v26, %s2683_s14  ;;  %v978_v43 = vsel %vm971_vm8, %v961_v15, %v771_v28 }
 0x176   :  { %724 = vrot.lane.b32.xlu1 %v325_v30, %s2681_s29 }
 0x177   :  { %v3423_v3 = vpop.permute.xlu0 %394 }
 0x178   :  { %v583_v19 = vpop.permute.xlu1 %582  ;;  %v880_v51 = vsel %vm154_vm0, %v3156_v2, %v3423_v3 }
 0x179   :  { %1537 = vrot.lane.b32.xlu0 %v1384_v39, %s2677_s0  ;;  %v929_v26 = vsel %vm920_vm5, %v912_v5, %v583_v19 }
 0x17a   :  { %788 = vrot.lane.b32.xlu1 %v341_v34, %s2682_s11  ;;  %v913_v34 = vsel %vm903_vm4, %v896_v24, %v3370_v25 }
 0x17b   :  { %v647_v46 = vpop.permute.xlu0 %646 }
 0x17c   :  { %v835_v44 = vpop.permute.xlu1 %834  ;;  %v946_v30 = vsel %vm937_vm6, %v929_v26, %v647_v46 }
 0x17d   :  { %v995_v48 = vsel %vm988_vm9, %v978_v43, %v835_v44  ;;  %1855 = vrot.lane.b32.xlu0 %v1464_v49, %s2684_s1 }
 0x17e   :  { %852 = vrot.lane.b32.xlu1 %v357_v36, %s2683_s14  ;;  %2568 = vmatprep.mubr.msk.f32.mxu0 %vm1010_vm10, %v995_v48 }
 0x17f   :  { %v3444_v58 = vpop.permute.xlu0 %396 }
 0x180   :  { %v585_v54 = vpop.permute.xlu1 %584  ;;  %v881_v2 = vsel %vm154_vm0, %v3192_v31, %v3444_v58 }
 0x181   :  { %1919 = vrot.lane.b32.xlu0 %v1480_v27, %s2685_s15  ;;  %v930_v38 = vsel %vm920_vm5, %v913_v34, %v585_v54 }
 0x182   :  { %1601 = vrot.lane.b32.xlu1 %v1400_v52, %s2679_s23 }
 0x183   :  { %v649_v60 = vpop.permute.xlu0 %648 }
 0x184   :  { %v837_v55 = vpop.permute.xlu1 %836  ;;  %v947_v39 = vsel %vm937_vm6, %v930_v38, %v649_v60 }
 0x185   :  { %v996_v0 = vsel %vm988_vm9, %v979_v62, %v837_v55  ;;  %1521 = vrot.lane.b32.xlu0 %v1376_v63, %s2677_s0 }
 0x186   :  { %2569 = vmatmul.mubr.msk.f32.gmra.mrb[6].mxu0 %vm1010_vm10, %v996_v0  ;;  %1983 = vrot.lane.b32.xlu1 %v1496_v29, %s2686_s16 }
 0x187   :  { %v461_v9 = vpop.permute.xlu0 %460 }
 0x188   :  { %v459_v7 = vpop.permute.xlu1 %458  ;;  %v898_v3 = vsel %vm886_vm2, %v881_v2, %v461_v9 }
 0x189   :  { %v897_v52 = vsel %vm886_vm2, %v880_v51, %v459_v7 }
 0x18a   :  { %1585 = vrot.lane.b32.xlu1 %v1392_v4, %s2679_s23 }
 0x18b   :  { %v713_v13 = vpop.permute.xlu0 %712 }
 0x18c   :  { %v711_v10 = vpop.permute.xlu1 %710  ;;  %v964_v42 = vsel %vm954_vm7, %v947_v39, %v713_v13 }
 0x18d   :  { %v963_v28 = vsel %vm954_vm7, %v946_v30, %v711_v10 }
 0x18f   :  { %v525_v41 = vpop.permute.xlu0 %524 }
 0x190   :  { %v523_v16 = vpop.permute.xlu1 %522  ;;  %v915_v63 = vsel %vm903_vm4, %v898_v3, %v525_v41 }
 0x191   :  { %v914_v53 = vsel %vm903_vm4, %v897_v52, %v523_v16 }
 0x193   :  { %v777_v20 = vpop.permute.xlu0 %776 }
 0x194   :  { %v775_v56 = vpop.permute.xlu1 %774  ;;  %v981_v15 = vsel %vm971_vm8, %v964_v42, %v777_v20 }
 0x195   :  { %v980_v6 = vsel %vm971_vm8, %v963_v28, %v775_v56 }
 0x197   :  { %v3466_v23 = vpop.permute.xlu0 %398 }
 0x198   :  { %v587_v21 = vpop.permute.xlu1 %586  ;;  %v882_v26 = vsel %vm154_vm0, %v3206_v40, %v3466_v23 }
 0x199   :  { %v931_v27 = vsel %vm920_vm5, %v914_v53, %v587_v21 }
 0x19b   :  { %v651_v33 = vpop.permute.xlu0 %650 }
 0x19c   :  { %v839_v12 = vpop.permute.xlu1 %838  ;;  %v948_v32 = vsel %vm937_vm6, %v931_v27, %v651_v33 }
 0x19d   :  { %v997_v57 = vsel %vm988_vm9, %v980_v6, %v839_v12 }
 0x19e   :  { %2571 = vmatprep.mubr.msk.f32.mxu0 %vm1010_vm10, %v997_v57 }
 0x19f   :  { %v401_v19 = vpop.permute.xlu0 %400 }
 0x1a0   :  { %v589_v35 = vpop.permute.xlu1 %588  ;;  %v883_v30 = vsel %vm154_vm0, %v3255_v17, %v401_v19 }
 0x1a1   :  { %v932_v7 = vsel %vm920_vm5, %v915_v63, %v589_v35  ;;  %v3558_v63 = vld [vmem:[%s4183_s3] ss:$0 sm:$0xff] }
 0x1a3   :  { %v653_v1 = vpop.permute.xlu0 %652 }
 0x1a4   :  { %v841_v36 = vpop.permute.xlu1 %840  ;;  %v949_v10 = vsel %vm937_vm6, %v932_v7, %v653_v1 }
 0x1a5   :  { %v998_v14 = vsel %vm988_vm9, %v981_v15, %v841_v36 }
 0x1a6   :  { %2572 = vmatmul.mubr.msk.f32.gmra.mrb[8].mxu0 %vm1010_vm10, %v998_v14 }
 0x1a7   :  { %v465_v43 = vpop.permute.xlu0 %464 }
 0x1a8   :  { %v463_v18 = vpop.permute.xlu1 %462  ;;  %v900_v6 = vsel %vm886_vm2, %v883_v30, %v465_v43 }
 0x1a9   :  { %v899_v28 = vsel %vm886_vm2, %v882_v26, %v463_v18 }
 0x1ab   :  { %v717_v25 = vpop.permute.xlu0 %716 }
 0x1ac   :  { %v715_v44 = vpop.permute.xlu1 %714  ;;  %v966_v13 = vsel %vm954_vm7, %v949_v10, %v717_v25 }
 0x1ad   :  { %v965_v37 = vsel %vm954_vm7, %v948_v32, %v715_v44 }
 0x1af   :  { %v529_v48 = vpop.permute.xlu0 %528 }
 0x1b0   :  { %v527_v46 = vpop.permute.xlu1 %526  ;;  %v917_v33 = vsel %vm903_vm4, %v900_v6, %v529_v48 }
 0x1b1   :  { %v916_v12 = vsel %vm903_vm4, %v899_v28, %v527_v46 }
 0x1b3   :  { %v781_v50 = vpop.permute.xlu0 %780 }
 0x1b4   :  { %v779_v49 = vpop.permute.xlu1 %778  ;;  %v983_v16 = vsel %vm971_vm8, %v966_v13, %v781_v50 }
 0x1b5   :  { %v982_v29 = vsel %vm971_vm8, %v965_v37, %v779_v49 }
 0x1b7   :  { %v403_v47 = vpop.permute.xlu0 %402 }
 0x1b8   :  { %v591_v54 = vpop.permute.xlu1 %590  ;;  %v884_v1 = vsel %vm154_vm0, %v3265_v22, %v403_v47 }
 0x1b9   :  { %v933_v24 = vsel %vm920_vm5, %v916_v12, %v591_v54 }
 0x1bb   :  { %v655_v55 = vpop.permute.xlu0 %654 }
 0x1bc   :  { %v843_v62 = vpop.permute.xlu1 %842  ;;  %v950_v35 = vsel %vm937_vm6, %v933_v24, %v655_v55 }
 0x1bd   :  { %v999_v60 = vsel %vm988_vm9, %v982_v29, %v843_v62 }
 0x1be   :  { %2574 = vmatprep.mubr.msk.f32.mxu0 %vm1010_vm10, %v999_v60 }
 0x1bf   :  { %v405_v4 = vpop.permute.xlu0 %404 }
 0x1c0   :  { %v593_v0 = vpop.permute.xlu1 %592  ;;  %v885_v54 = vsel %vm154_vm0, %v3319_v59, %v405_v4  ;;  %v3553_v59 = vld [vmem:[%s4182_s2] ss:$0 sm:$0xff]  ;;  %s2687_s2 = smov 40  }
 0x1c1   :  { %v934_v34 = vsel %vm920_vm5, %v917_v33, %v593_v0 }
 0x1c3   :  { %v657_v56 = vpop.permute.xlu0 %656 }
 0x1c4   :  { %v845_v45 = vpop.permute.xlu1 %844  ;;  %v951_v40 = vsel %vm937_vm6, %v934_v34, %v657_v56 }
 0x1c5   :  { %v1000_v31 = vsel %vm988_vm9, %v983_v16, %v845_v45 }
 0x1c6   :  { %2575 = vmatmul.mubr.msk.f32.gmra.mrb[10].mxu0 %vm1010_vm10, %v1000_v31 }
 0x1c7   :  { %v469_v9 = vpop.permute.xlu0 %468 }
 0x1c8   :  { %v467_v58 = vpop.permute.xlu1 %466  ;;  %v902_v47 = vsel %vm886_vm2, %v885_v54, %v469_v9  ;;  %v2154_v54 = vld [vmem:[%s4184_s4 + $0x28] sm:$0xff] }
 0x1c9   :  { %v901_v43 = vsel %vm886_vm2, %v884_v1, %v467_v58 }
 0x1cb   :  { %v721_v41 = vpop.permute.xlu0 %720 }
 0x1cc   :  { %v719_v20 = vpop.permute.xlu1 %718  ;;  %v968_v23 = vsel %vm954_vm7, %v951_v40, %v721_v41 }
 0x1cd   :  { %v967_v17 = vsel %vm954_vm7, %v950_v35, %v719_v20 }
 0x1cf   :  { %v533_v61 = vpop.permute.xlu0 %532 }
 0x1d0   :  { %v531_v8 = vpop.permute.xlu1 %530  ;;  %v919_v27 = vsel %vm903_vm4, %v902_v47, %v533_v61 }
 0x1d1   :  { %v918_v44 = vsel %vm903_vm4, %v901_v43, %v531_v8 }
 0x1d3   :  { %v785_v21 = vpop.permute.xlu0 %784 }
 0x1d4   :  { %v783_v5 = vpop.permute.xlu1 %782  ;;  %v985_v38 = vsel %vm971_vm8, %v968_v23, %v785_v21 }
 0x1d5   :  { %v984_v19 = vsel %vm971_vm8, %v967_v17, %v783_v5 }
 0x1d7   :  { %v597_v11 = vpop.permute.xlu0 %596 }
 0x1d8   :  { %v595_v57 = vpop.permute.xlu1 %594  ;;  %v936_v37 = vsel %vm920_vm5, %v919_v27, %v597_v11 }
 0x1d9   :  { %v935_v25 = vsel %vm920_vm5, %v918_v44, %v595_v57 }
 0x1db   :  { %v849_v42 = vpop.permute.xlu0 %848 }
 0x1dc   :  { %v847_v39 = vpop.permute.xlu1 %846  ;;  %v1002_v36 = vsel %vm988_vm9, %v985_v38, %v849_v42 }
 0x1dd   :  { %v1001_v15 = vsel %vm988_vm9, %v984_v19, %v847_v39 }
 0x1de   :  { %2577 = vmatprep.mubr.msk.f32.mxu0 %vm1010_vm10, %v1001_v15 }
 0x1df   :  { %2578 = vmatmul.mubr.msk.f32.gmra.mrb[12].mxu0 %vm1010_vm10, %v1002_v36  ;;  %v723_v18 = vpop.permute.xlu0 %722 }
 0x1e0   :  { %v659_v14 = vpop.permute.xlu1 %658 }
 0x1e1   :  { %v952_v46 = vsel %vm937_vm6, %v935_v25, %v659_v14  ;;  %v2149_v25 = vld [vmem:[%s4184_s4] sm:$0xff] }
 0x1e2   :  { %v969_v50 = vsel %vm954_vm7, %v952_v46, %v723_v18  ;;  %v2150_v46 = vld [vmem:[%s4184_s4 + $0x8] sm:$0xff] }
 0x1e3   :  { %v787_v49 = vpop.permute.xlu0 %786 }
 0x1e4   :  { %v661_v48 = vpop.permute.xlu1 %660  ;;  %v986_v51 = vsel %vm971_vm8, %v969_v50, %v787_v49  ;;  %v2151_v50 = vld [vmem:[%s4184_s4 + $0x10] sm:$0xff] }
 0x1e5   :  { %v953_v29 = vsel %vm937_vm6, %v936_v37, %v661_v48  ;;  %v2633_v48 = vpack.c.bf16 %v2150_v46, %v2149_v25  ;;  %v2156_v37 = vld [vmem:[%s4184_s4 + $0x38] sm:$0xff] }
 0x1e7   :  { %v851_v53 = vpop.permute.xlu0 %850  ;;  %2649 = vmatprep.subr.bf16.mxu1 %v2633_v48  ;;  %2634 = vmatprep.subr.bf16.mxu0 %v2633_v48 }
 0x1e8   :  { %v725_v52 = vpop.permute.xlu1 %724  ;;  %v1003_v22 = vsel %vm988_vm9, %v986_v51, %v851_v53  ;;  %v2152_v51 = vld [vmem:[%s4184_s4 + $0x18] sm:$0xff]  ;;  %2654 = vmatpush3.bf16.msra.mxu1 %v2633_v48  ;;  %2636 = vmatpush3.bf16.msra.mxu0 %v2633_v48 }
 0x1e9   :  { %2580 = vmatprep.mubr.msk.f32.mxu0 %vm1010_vm10, %v1003_v22  ;;  %v970_v62 = vsel %vm954_vm7, %v953_v29, %v725_v52  ;;  %v2637_v52 = vpack.c.bf16 %v2152_v51, %v2151_v50  ;;  %v2153_v22 = vld [vmem:[%s4184_s4 + $0x20] sm:$0xff] }
 0x1ea   :  { %v2641_v47 = vpack.c.bf16 %v2154_v54, %v2153_v22 }
 0x1eb   :  { %2650 = vmatprep.subr.bf16.mxu1 %v2637_v52  ;;  %2638 = vmatprep.subr.bf16.mxu0 %v2637_v52 }
 0x1ec   :  { %v789_v32 = vpop.permute.xlu1 %788  ;;  %2655 = vmatpush3.bf16.msra.mxu1 %v2637_v52  ;;  %2640 = vmatpush3.bf16.msra.mxu0 %v2637_v52 }
 0x1ed   :  { %v987_v55 = vsel %vm971_vm8, %v970_v62, %v789_v32  ;;  %2651 = vmatprep.subr.bf16.mxu1 %v2641_v47  ;;  %v2155_v32 = vld [vmem:[%s4184_s4 + $0x30] sm:$0xff]  ;;  %2642 = vmatprep.subr.bf16.mxu0 %v2641_v47 }
 0x1ee   :  { %v2645_v29 = vpack.c.bf16 %v2156_v37, %v2155_v32 }
 0x1f0   :  { %v853_v60 = vpop.permute.xlu1 %852  ;;  %2656 = vmatpush3.bf16.msra.mxu1 %v2641_v47  ;;  %2644 = vmatpush3.bf16.msra.mxu0 %v2641_v47 }
 0x1f1   :  { %v1004_v2 = vsel %vm988_vm9, %v987_v55, %v853_v60  ;;  %2652 = vmatprep.subr.bf16.mxu1 %v2645_v29  ;;  %2646 = vmatprep.subr.bf16.mxu0 %v2645_v29 }
 0x1f2   :  { %2581 = vmatmul.mubr.msk.f32.gmra.mrb[14].mxu0 %vm1010_vm10, %v1004_v2 }
 0x1f4   :  { %2657 = vmatpush3.bf16.msra.mxu1 %v2645_v29  ;;  %2648 = vmatpush3.bf16.msra.mxu0 %v2645_v29 }
 0x1f9   :  { %v2561_v3 = vpop.f32.mrb[0].mxu0 }
 0x1fa   :  { %v1216_v0 = vmul.f32 %v2561_v3, %v3553_v59  ;;  %v1129_v4 = vpop.f32.mrb[1].mxu0 }
 0x1fb   :  { %v1215_v7 = vmul.f32 %v3553_v59, %v1129_v4 }
 0x1fc   :  { %v1239_v10 = vadd.f32 %v3558_v63, %v1216_v0  ;;  %v2157_v0 = vld [vmem:[%s4184_s4 + $0x40] sm:$0xff] }
 0x1fd   :  { %v1238_v13 = vadd.f32 %v3558_v63, %v1215_v7  ;;  %2653 = vmatprep.subr.mxu1 %v2157_v0  ;;  %2599 = vmatprep.subr.mxu0 %v2157_v0 }
 0x1fe   :  { %vm1255_vm12 = vcmp.gt.f32.partialorder %v1239_v10, 0.0  ;;  %v1271_v16 = vmul.f32 0.01, %v1239_v10  ;;  %2658 = vmatpush3.msra.mxu1 %v2157_v0  ;;  %2600 = vmatpush3.msra.mxu0 %v2157_v0 }
 0x1ff   :  { %vm1254_vm13 = vcmp.gt.f32.partialorder %v1238_v13, 0.0  ;;  %v1270_v45 = vmul.f32 0.01, %v1238_v13 }
 0x200   :  { %v1287_v56 = vsel %vm1255_vm12, %v1239_v10, %v1271_v16 }
 0x201   :  { %1345 = vst.msk [vmem:[#allocation3 + $0x21] sm:$0xff] %vm886_vm2, %v1287_v56  ;;  %v1286_v31 = vsel %vm1254_vm13, %v1238_v13, %v1270_v45 }
 0x202   :  { %1344 = vst.msk [vmem:[#allocation3 + $0x11] sm:$0xff] %vm886_vm2, %v1286_v31 }
 0x208   :  { %v3566_v58 = vld [vmem:[#allocation3 + $0x20] sm:$0xff] }
 0x209   :  { %v1378_v9 = vld [vmem:[#allocation3 + $0x21] sm:$0xff]  ;;  %1651 = vrot.lane.b32.xlu1 %v3566_v58, %s2681_s29  ;;  %v1377_v41 = vld [vmem:[#allocation3 + $0x11] sm:$0xff] }
 0x20a   :  { %1525 = vrot.lane.b32.xlu0 %v1378_v9, %s2677_s0  ;;  %v3571_v20 = vld [vmem:[#allocation3 + $0x22] sm:$0xff]  ;;  %v1393_v8 = vld [vmem:[#allocation3 + $0x12] sm:$0xff] }
 0x20b   :  { %v1408_v61 = vld [vmem:[#allocation3 + $0x10] sm:$0xff] }
 0x20d   :  { %1715 = vrot.lane.b32.xlu1 %v1378_v9, %s2683_s14  ;;  %v3679_v9 = vpop.permute.xlu1 %1601 }
 0x20e   :  { %1589 = vrot.lane.b32.xlu0 %v3571_v20, %s2679_s23 }
 0x211   :  { %1523 = vrot.lane.b32.xlu1 %v1377_v41, %s2677_s0 }
 0x215   :  { %1587 = vrot.lane.b32.xlu1 %v1393_v8, %s2679_s23 }
 0x219   :  { %1649 = vrot.lane.b32.xlu1 %v1408_v61, %s2681_s29  ;;  %v2564_v5 = vpop.f32.mrb[2].mxu0  ;;  %v3683_v61 = vpop.permute.xlu1 %1983 }
 0x21a   :  { %v1218_v21 = vmul.f32 %v2564_v5, %v3553_v59  ;;  %v1139_v26 = vpop.f32.mrb[3].mxu0 }
 0x21b   :  { %v1217_v30 = vmul.f32 %v3553_v59, %v1139_v26 }
 0x21c   :  { %v1241_v28 = vadd.f32 %v3558_v63, %v1218_v21 }
 0x21d   :  { %v1240_v6 = vadd.f32 %v3558_v63, %v1217_v30  ;;  %1713 = vrot.lane.b32.xlu1 %v1377_v41, %s2683_s14  ;;  %v3689_v26 = vpop.permute.xlu1 %1585 }
 0x21e   :  { %vm1257_vm14 = vcmp.gt.f32.partialorder %v1241_v28, 0.0  ;;  %v1273_v12 = vmul.f32 0.01, %v1241_v28 }
 0x21f   :  { %vm1256_vm15 = vcmp.gt.f32.partialorder %v1240_v6, 0.0  ;;  %v1272_v33 = vmul.f32 0.01, %v1240_v6 }
 0x220   :  { %v1289_v57 = vsel %vm1257_vm14, %v1241_v28, %v1273_v12  ;;  %vm2098_vm14 = vcmask 392192  }
 0x221   :  { %1347 = vst.msk [vmem:[#allocation3 + $0x41] sm:$0xff] %vm886_vm2, %v1289_v57  ;;  %v1288_v11 = vsel %vm1256_vm15, %v1240_v6, %v1272_v33  ;;  %1777 = vrot.lane.b32.xlu1 %v1393_v8, %s2687_s2  ;;  %vm2081_vm15 = vcmask 326656  }
 0x222   :  { %1346 = vst.msk [vmem:[#allocation3 + $0x31] sm:$0xff] %vm886_vm2, %v1288_v11 }
 0x228   :  { %v3587_v24 = vld [vmem:[#allocation3 + $0x40] sm:$0xff] }
 0x229   :  { %v1427_v34 = vld [vmem:[#allocation3 + $0x41] sm:$0xff]  ;;  %1655 = vrot.lane.b32.xlu1 %v3587_v24, %s2681_s29  ;;  %v3594_v40 = vld [vmem:[#allocation3 + $0x30] sm:$0xff] }
 0x22a   :  { %1719 = vrot.lane.b32.xlu0 %v1427_v34, %s2683_s14  ;;  %v1443_v35 = vld [vmem:[#allocation3 + $0x42] sm:$0xff]  ;;  %v3599_v17 = vld [vmem:[#allocation3 + $0x31] sm:$0xff] }
 0x22b   :  { %v3615_v43 = vld [vmem:[#allocation3 + $0x32] sm:$0xff] }
 0x22d   :  { %1529 = vrot.lane.b32.xlu1 %v1427_v34, %s2677_s0 }
 0x22e   :  { %1783 = vrot.lane.b32.xlu0 %v1443_v35, %s2687_s2 }
 0x231   :  { %1593 = vrot.lane.b32.xlu1 %v1443_v35, %s2679_s23 }
 0x232   :  { %1653 = vrot.lane.b32.xlu0 %v3594_v40, %s2681_s29 }
 0x235   :  { %1845 = vrot.lane.b32.xlu1 %v3587_v24, %s2684_s1 }
 0x236   :  { %1717 = vrot.lane.b32.xlu0 %v3599_v17, %s2683_s14 }
 0x239   :  { %1909 = vrot.lane.b32.xlu1 %v1427_v34, %s2685_s15  ;;  %v2567_v23 = vpop.f32.mrb[4].mxu0 }
 0x23a   :  { %v1220_v19 = vmul.f32 %v2567_v23, %v3553_v59  ;;  %v1149_v38 = vpop.f32.mrb[5].mxu0 }
 0x23b   :  { %v1219_v39 = vmul.f32 %v3553_v59, %v1149_v38 }
 0x23c   :  { %v1243_v42 = vadd.f32 %v3558_v63, %v1220_v19 }
 0x23d   :  { %v1242_v15 = vadd.f32 %v3558_v63, %v1219_v39  ;;  %1973 = vrot.lane.b32.xlu1 %v1443_v35, %s2686_s16 }
 0x23e   :  { %vm1259_vm0 = vcmp.gt.f32.partialorder %v1243_v42, 0.0  ;;  %v1275_v36 = vmul.f32 0.01, %v1243_v42 }
 0x23f   :  { %vm1258_vm1 = vcmp.gt.f32.partialorder %v1242_v15, 0.0  ;;  %v1274_v1 = vmul.f32 0.01, %v1242_v15 }
 0x240   :  { %v1291_v14 = vsel %vm1259_vm0, %v1243_v42, %v1275_v36  ;;  %v3711_v42 = vpop.permute.xlu0 %1537  ;;  %vm2115_vm0 = vcmask 457728  }
 0x241   :  { %1349 = vst.msk [vmem:[#allocation3 + $0x61] sm:$0xff] %vm886_vm2, %v1291_v14  ;;  %v1290_v18 = vsel %vm1258_vm1, %v1242_v15, %v1274_v1  ;;  %1527 = vrot.lane.b32.xlu1 %v3599_v17, %s2677_s0  ;;  %vm2132_vm1 = vcmask 523264  }
 0x242   :  { %1348 = vst.msk [vmem:[#allocation3 + $0x51] sm:$0xff] %vm886_vm2, %v1290_v18 }
 0x244   :  { %v3722_v18 = vpop.permute.xlu0 %1855 }
 0x245   :  { %1591 = vrot.lane.b32.xlu1 %v3615_v43, %s2679_s23 }
 0x248   :  { %v3619_v44 = vld [vmem:[#allocation3 + $0x60] sm:$0xff]  ;;  %v3729_v48 = vpop.permute.xlu0 %1919 }
 0x249   :  { %1781 = vrot.lane.b32.xlu1 %v3615_v43, %s2687_s2  ;;  %1659 = vrot.lane.b32.xlu0 %v3619_v44, %s2681_s29  ;;  %v1429_v49 = vld [vmem:[#allocation3 + $0x61] sm:$0xff]  ;;  %v1381_v27 = vld [vmem:[#allocation3 + $0x51] sm:$0xff] }
 0x24a   :  { %v1398_v53 = vld [vmem:[#allocation3 + $0x62] sm:$0xff]  ;;  %v1397_v62 = vld [vmem:[#allocation3 + $0x52] sm:$0xff] }
 0x24b   :  { %v3665_v10 = vld [vmem:[#allocation3 + $0x50] sm:$0xff] }
 0x24c   :  { %v3737_v51 = vpop.permute.xlu0 %1521 }
 0x24d   :  { %1723 = vrot.lane.b32.xlu1 %v1429_v49, %s2683_s14  ;;  %1533 = vrot.lane.b32.xlu0 %v1429_v49, %s2677_s0 }
 0x251   :  { %1597 = vrot.lane.b32.xlu1 %v1398_v53, %s2679_s23  ;;  %1787 = vrot.lane.b32.xlu0 %v1398_v53, %s2687_s2 }
 0x255   :  { %1849 = vrot.lane.b32.xlu1 %v3619_v44, %s2684_s1  ;;  %1531 = vrot.lane.b32.xlu0 %v1381_v27, %s2677_s0 }
 0x259   :  { %v2570_v55 = vpop.f32.mrb[6].mxu0  ;;  %1913 = vrot.lane.b32.xlu1 %v1429_v49, %s2685_s15  ;;  %1595 = vrot.lane.b32.xlu0 %v1397_v62, %s2679_s23 }
 0x25a   :  { %v1222_v60 = vmul.f32 %v2570_v55, %v3553_v59  ;;  %v1159_v2 = vpop.f32.mrb[7].mxu0 }
 0x25b   :  { %v1221_v3 = vmul.f32 %v3553_v59, %v1159_v2 }
 0x25c   :  { %v1245_v4 = vadd.f32 %v3558_v63, %v1222_v60 }
 0x25d   :  { %v1244_v7 = vadd.f32 %v3558_v63, %v1221_v3  ;;  %1977 = vrot.lane.b32.xlu1 %v1398_v53, %s2686_s16  ;;  %1847 = vrot.lane.b32.xlu0 %v3665_v10, %s2684_s1 }
 0x25e   :  { %vm1261_vm3 = vcmp.gt.f32.partialorder %v1245_v4, 0.0  ;;  %v1277_v13 = vmul.f32 0.01, %v1245_v4 }
 0x25f   :  { %vm1260_vm4 = vcmp.gt.f32.partialorder %v1244_v7, 0.0  ;;  %v1276_v16 = vmul.f32 0.01, %v1244_v7 }
 0x260   :  { %v1293_v45 = vsel %vm1261_vm3, %v1245_v4, %v1277_v13  ;;  %vm2158_vm3 = vcmask 588800  }
 0x261   :  { %1351 = vst.msk [vmem:[#allocation3 + $0x81] sm:$0xff] %vm886_vm2, %v1293_v45  ;;  %v1292_v56 = vsel %vm1260_vm4, %v1244_v7, %v1276_v16  ;;  %1657 = vrot.lane.b32.xlu1 %v3665_v10, %s2681_s29  ;;  %1911 = vrot.lane.b32.xlu0 %v1381_v27, %s2685_s15 }
 0x262   :  { %1350 = vst.msk [vmem:[#allocation3 + $0x71] sm:$0xff] %vm886_vm2, %v1292_v56 }
 0x265   :  { %1721 = vrot.lane.b32.xlu1 %v1381_v27, %s2683_s14  ;;  %1785 = vrot.lane.b32.xlu0 %v1397_v62, %s2687_s2 }
 0x268   :  { %v1415_v31 = vld [vmem:[#allocation3 + $0x80] sm:$0xff] }
 0x269   :  { %1975 = vrot.lane.b32.xlu1 %v1397_v62, %s2686_s16  ;;  %1663 = vrot.lane.b32.xlu0 %v1415_v31, %s2681_s29  ;;  %v1431_v41 = vld [vmem:[#allocation3 + $0x81] sm:$0xff]  ;;  %v1383_v5 = vld [vmem:[#allocation3 + $0x71] sm:$0xff] }
 0x26a   :  { %v1447_v8 = vld [vmem:[#allocation3 + $0x82] sm:$0xff]  ;;  %v1399_v21 = vld [vmem:[#allocation3 + $0x72] sm:$0xff] }
 0x26b   :  { %v3691_v30 = vld [vmem:[#allocation3 + $0x70] sm:$0xff] }
 0x26d   :  { %1727 = vrot.lane.b32.xlu1 %v1431_v41, %s2683_s14  ;;  %1791 = vrot.lane.b32.xlu0 %v1447_v8, %s2687_s2 }
 0x271   :  { %1853 = vrot.lane.b32.xlu1 %v1415_v31, %s2684_s1  ;;  %1535 = vrot.lane.b32.xlu0 %v1383_v5, %s2677_s0 }
 0x275   :  { %1917 = vrot.lane.b32.xlu1 %v1431_v41, %s2685_s15  ;;  %1599 = vrot.lane.b32.xlu0 %v1399_v21, %s2679_s23 }
 0x279   :  { %v2573_v28 = vpop.f32.mrb[8].mxu0  ;;  %1981 = vrot.lane.b32.xlu1 %v1447_v8, %s2686_s16  ;;  %1851 = vrot.lane.b32.xlu0 %v3691_v30, %s2684_s1 }
 0x27a   :  { %v1224_v6 = vmul.f32 %v2573_v28, %v3553_v59  ;;  %v1169_v12 = vpop.f32.mrb[9].mxu0 }
 0x27b   :  { %v1223_v33 = vmul.f32 %v3553_v59, %v1169_v12  ;;  %v3699_v11 = vpop.permute.xlu1 %1651 }
 0x27c   :  { %v1247_v57 = vadd.f32 %v3558_v63, %v1224_v6  ;;  %v1526_v32 = vpop.permute.xlu0 %1525 }
 0x27d   :  { %v1246_v34 = vadd.f32 %v3558_v63, %v1223_v33  ;;  %1661 = vrot.lane.b32.xlu1 %v3691_v30, %s2681_s29  ;;  %1915 = vrot.lane.b32.xlu0 %v1383_v5, %s2685_s15 }
 0x27e   :  { %vm1263_vm6 = vcmp.gt.f32.partialorder %v1247_v57, 0.0  ;;  %v1279_v35 = vmul.f32 0.01, %v1247_v57 }
 0x27f   :  { %vm1262_vm8 = vcmp.gt.f32.partialorder %v1246_v34, 0.0  ;;  %v1278_v23 = vmul.f32 0.01, %v1246_v34  ;;  %v3705_v38 = vpop.permute.xlu1 %1715 }
 0x280   :  { %v1295_v19 = vsel %vm1263_vm6, %v1247_v57, %v1279_v35  ;;  %v1590_v7 = vpop.permute.xlu0 %1589 }
 0x281   :  { %1353 = vst.msk [vmem:[#allocation3 + $0xc1] sm:$0xff] %vm886_vm2, %v1295_v19  ;;  %v1294_v39 = vsel %vm1262_vm8, %v1246_v34, %v1278_v23  ;;  %1725 = vrot.lane.b32.xlu1 %v1383_v5, %s2683_s14  ;;  %1789 = vrot.lane.b32.xlu0 %v1399_v21, %s2687_s2 }
 0x282   :  { %1352 = vst.msk [vmem:[#allocation3 + $0xb1] sm:$0xff] %vm886_vm2, %v1294_v39 }
 0x283   :  { %v3713_v15 = vpop.permute.xlu1 %1523 }
 0x285   :  { %1979 = vrot.lane.b32.xlu1 %v1399_v21, %s2686_s16 }
 0x287   :  { %v3716_v36 = vpop.permute.xlu1 %1587 }
 0x288   :  { %v1433_v1 = vld [vmem:[#allocation3 + $0xc1] sm:$0xff] }
 0x289   :  { %v3718_v14 = vld [vmem:[#allocation3 + $0xc0] sm:$0xff]  ;;  %1731 = vrot.lane.b32.xlu1 %v1433_v1, %s2683_s14  ;;  %v1385_v50 = vld [vmem:[#allocation3 + $0xb1] sm:$0xff] }
 0x28a   :  { %1667 = vrot.lane.b32.xlu0 %v3718_v14, %s2681_s29  ;;  %v1402_v46 = vld [vmem:[#allocation3 + $0xc2] sm:$0xff]  ;;  %v1401_v53 = vld [vmem:[#allocation3 + $0xb2] sm:$0xff] }
 0x28b   :  { %v3725_v25 = vpop.permute.xlu1 %1649  ;;  %v3750_v55 = vld [vmem:[#allocation3 + $0xb0] sm:$0xff] }
 0x28d   :  { %1605 = vrot.lane.b32.xlu1 %v1402_v46, %s2679_s23 }
 0x28e   :  { %1541 = vrot.lane.b32.xlu0 %v1433_v1, %s2677_s0 }
 0x28f   :  { %v3732_v49 = vpop.permute.xlu1 %1713 }
 0x291   :  { %1857 = vrot.lane.b32.xlu1 %v3718_v14, %s2684_s1 }
 0x292   :  { %1795 = vrot.lane.b32.xlu0 %v1402_v46, %s2687_s2 }
 0x293   :  { %v3740_v52 = vpop.permute.xlu1 %1777 }
 0x295   :  { %1921 = vrot.lane.b32.xlu1 %v1433_v1, %s2685_s15 }
 0x296   :  { %1539 = vrot.lane.b32.xlu0 %v1385_v50, %s2677_s0 }
 0x299   :  { %v2576_v22 = vpop.f32.mrb[10].mxu0  ;;  %1985 = vrot.lane.b32.xlu1 %v1402_v46, %s2686_s16 }
 0x29a   :  { %1603 = vrot.lane.b32.xlu0 %v1401_v53, %s2679_s23  ;;  %v1226_v54 = vmul.f32 %v2576_v22, %v3553_v59  ;;  %v1179_v47 = vpop.f32.mrb[11].mxu0  ;;  %v2019_v22 = vsel %vm886_vm2, %v3566_v58, %v1526_v32 }
 0x29b   :  { %v1225_v27 = vmul.f32 %v3553_v59, %v1179_v47  ;;  %v3747_v29 = vpop.permute.xlu1 %1655  ;;  %v2035_v47 = vsel %vm920_vm5, %v2019_v22, %v1590_v7 }
 0x29c   :  { %v1249_v37 = vadd.f32 %v3558_v63, %v1226_v54  ;;  %v3762_v16 = vpop.permute.xlu0 %1719 }
 0x29d   :  { %v1248_v62 = vadd.f32 %v3558_v63, %v1225_v27  ;;  %1665 = vrot.lane.b32.xlu1 %v3750_v55, %s2681_s29 }
 0x29e   :  { %1793 = vrot.lane.b32.xlu0 %v1401_v53, %s2687_s2  ;;  %vm1265_vm10 = vcmp.gt.f32.partialorder %v1249_v37, 0.0  ;;  %v1281_v60 = vmul.f32 0.01, %v1249_v37 }
 0x29f   :  { %vm1264_vm11 = vcmp.gt.f32.partialorder %v1248_v62, 0.0  ;;  %v1280_v2 = vmul.f32 0.01, %v1248_v62  ;;  %v3755_v0 = vpop.permute.xlu1 %1529 }
 0x2a0   :  { %v1297_v3 = vsel %vm1265_vm10, %v1249_v37, %v1281_v60  ;;  %v3769_v41 = vpop.permute.xlu0 %1783 }
 0x2a1   :  { %1355 = vst.msk [vmem:[#allocation3 + $0xe1] sm:$0xff] %vm886_vm2, %v1297_v3  ;;  %v1296_v4 = vsel %vm1264_vm11, %v1248_v62, %v1280_v2  ;;  %1729 = vrot.lane.b32.xlu1 %v1385_v50, %s2683_s14 }
 0x2a2   :  { %1354 = vst.msk [vmem:[#allocation3 + $0xd1] sm:$0xff] %vm886_vm2, %v1296_v4 }
 0x2a3   :  { %v3760_v13 = vpop.permute.xlu1 %1593 }
 0x2a4   :  { %v1654_v28 = vpop.permute.xlu0 %1653 }
 0x2a5   :  { %v2051_v37 = vsel %vm954_vm7, %v2035_v47, %v1654_v28 }
 0x2a7   :  { %v1846_v45 = vpop.permute.xlu1 %1845 }
 0x2a8   :  { %v1435_v56 = vld [vmem:[#allocation3 + $0xe1] sm:$0xff]  ;;  %v1718_v1 = vpop.permute.xlu0 %1717 }
 0x2a9   :  { %v3764_v31 = vld [vmem:[#allocation3 + $0xe0] sm:$0xff]  ;;  %1735 = vrot.lane.b32.xlu1 %v1435_v56, %s2683_s14  ;;  %v1387_v35 = vld [vmem:[#allocation3 + $0xd1] sm:$0xff]  ;;  %v2067_v62 = vsel %vm988_vm9, %v2051_v37, %v1718_v1 }
 0x2aa   :  { %1671 = vrot.lane.b32.xlu0 %v3764_v31, %s2681_s29  ;;  %v1404_v5 = vld [vmem:[#allocation3 + $0xe2] sm:$0xff]  ;;  %v1403_v53 = vld [vmem:[#allocation3 + $0xd2] sm:$0xff] }
 0x2ab   :  { %v1910_v8 = vpop.permute.xlu1 %1909  ;;  %v3797_v32 = vld [vmem:[#allocation3 + $0xd0] sm:$0xff] }
 0x2ad   :  { %1609 = vrot.lane.b32.xlu1 %v1404_v5, %s2679_s23 }
 0x2ae   :  { %1545 = vrot.lane.b32.xlu0 %v1435_v56, %s2677_s0 }
 0x2af   :  { %v1974_v21 = vpop.permute.xlu1 %1973 }
 0x2b1   :  { %1861 = vrot.lane.b32.xlu1 %v3764_v31, %s2684_s1 }
 0x2b2   :  { %1799 = vrot.lane.b32.xlu0 %v1404_v5, %s2687_s2  ;;  %v2579_v6 = vpop.f32.mrb[12].mxu0 }
 0x2b3   :  { %v1228_v12 = vmul.f32 %v2579_v6, %v3553_v59  ;;  %v1189_v33 = vpop.f32.mrb[13].mxu0  ;;  %v3777_v57 = vpop.permute.xlu1 %1527 }
 0x2b4   :  { %v1227_v34 = vmul.f32 %v3553_v59, %v1189_v33 }
 0x2b5   :  { %v1251_v23 = vadd.f32 %v3558_v63, %v1228_v12  ;;  %1925 = vrot.lane.b32.xlu1 %v1435_v56, %s2685_s15 }
 0x2b6   :  { %1543 = vrot.lane.b32.xlu0 %v1387_v35, %s2677_s0  ;;  %v1250_v19 = vadd.f32 %v3558_v63, %v1227_v34 }
 0x2b7   :  { %vm1267_vm12 = vcmp.gt.f32.partialorder %v1251_v23, 0.0  ;;  %v1283_v39 = vmul.f32 0.01, %v1251_v23  ;;  %v3784_v50 = vpop.permute.xlu1 %1591 }
 0x2b8   :  { %vm1266_vm13 = vcmp.gt.f32.partialorder %v1250_v19, 0.0  ;;  %v1282_v46 = vmul.f32 0.01, %v1250_v19 }
 0x2b9   :  { %v1299_v54 = vsel %vm1267_vm12, %v1251_v23, %v1283_v39  ;;  %1989 = vrot.lane.b32.xlu1 %v1404_v5, %s2686_s16 }
 0x2ba   :  { %1607 = vrot.lane.b32.xlu0 %v1403_v53, %s2679_s23  ;;  %1357 = vst.msk [vmem:[#allocation3 + $0x101] sm:$0xff] %vm886_vm2, %v1299_v54  ;;  %v1298_v27 = vsel %vm1266_vm13, %v1250_v19, %v1282_v46 }
 0x2bb   :  { %1356 = vst.msk [vmem:[#allocation3 + $0xf1] sm:$0xff] %vm886_vm2, %v1298_v27  ;;  %v1782_v60 = vpop.permute.xlu1 %1781  ;;  %v3795_v58 = vpop.permute.xlu0 %1659 }
 0x2bc   :  { %v2084_v2 = vsel %vm2081_vm15, %v2067_v62, %v1782_v60 }
 0x2bd   :  { %1669 = vrot.lane.b32.xlu1 %v3797_v32, %s2681_s29  ;;  %v2101_v3 = vsel %vm2098_vm14, %v2084_v2, %v1846_v45 }
 0x2be   :  { %1859 = vrot.lane.b32.xlu0 %v3797_v32, %s2684_s1  ;;  %v2118_v4 = vsel %vm2115_vm0, %v2101_v3, %v1910_v8 }
 0x2bf   :  { %v3806_v7 = vpop.permute.xlu1 %1723  ;;  %v3808_v56 = vpop.permute.xlu0 %1533  ;;  %v2135_v5 = vsel %vm2132_vm1, %v2118_v4, %v1974_v21 }
 0x2c0   :  { %2604 = vmatprep.mubr.msk.f32.mxu1 %vm2158_vm3, %v2135_v5 }
 0x2c1   :  { %1733 = vrot.lane.b32.xlu1 %v1387_v35, %s2683_s14  ;;  %v3826_v39 = vld [vmem:[#allocation3 + $0x100] sm:$0xff] }
 0x2c2   :  { %1923 = vrot.lane.b32.xlu0 %v1387_v35, %s2685_s15  ;;  %v1390_v35 = vld [vmem:[#allocation3 + $0x101] sm:$0xff]  ;;  %v3840_v62 = vld [vmem:[#allocation3 + $0xf0] sm:$0xff] }
 0x2c3   :  { %v3814_v28 = vpop.permute.xlu1 %1597  ;;  %v3816_v6 = vpop.permute.xlu0 %1787  ;;  %v1453_v54 = vld [vmem:[#allocation3 + $0x102] sm:$0xff]  ;;  %v1436_v5 = vld [vmem:[#allocation3 + $0xf1] sm:$0xff] }
 0x2c5   :  { %1987 = vrot.lane.b32.xlu1 %v1403_v53, %s2686_s16  ;;  %v2582_v45 = vpop.f32.mrb[14].mxu0 }
 0x2c6   :  { %1797 = vrot.lane.b32.xlu0 %v1403_v53, %s2687_s2  ;;  %v1230_v8 = vmul.f32 %v2582_v45, %v3553_v59  ;;  %v1199_v12 = vpop.f32.mrb[15].mxu0 }
 0x2c7   :  { %v1229_v21 = vmul.f32 %v3553_v59, %v1199_v12  ;;  %v1850_v34 = vpop.permute.xlu1 %1849  ;;  %v3823_v23 = vpop.permute.xlu0 %1531 }
 0x2c8   :  { %v1253_v33 = vadd.f32 %v3558_v63, %v1230_v8 }
 0x2c9   :  { %v1252_v19 = vadd.f32 %v3558_v63, %v1229_v21  ;;  %1549 = vrot.lane.b32.xlu1 %v1390_v35, %s2677_s0  ;;  %v2020_v63 = vsel %vm886_vm2, %v3594_v40, %v3777_v57  ;;  %v2021_v57 = vsel %vm886_vm2, %v3587_v24, %v3755_v0  ;;  %v1452_v21 = vld [vmem:[#allocation3 + $0xf2] sm:$0xff] }
 0x2ca   :  { %vm1269_vm4 = vcmp.gt.f32.partialorder %v1253_v33, 0.0  ;;  %v1285_v1 = vmul.f32 0.01, %v1253_v33  ;;  %1675 = vrot.lane.b32.xlu0 %v3826_v39, %s2681_s29  ;;  %v2036_v60 = vsel %vm920_vm5, %v2020_v63, %v3784_v50  ;;  %v2037_v50 = vsel %vm920_vm5, %v2021_v57, %v3760_v13 }
 0x2cb   :  { %vm1268_vm6 = vcmp.gt.f32.partialorder %v1252_v19, 0.0  ;;  %v1284_v46 = vmul.f32 0.01, %v1252_v19  ;;  %v1914_v53 = vpop.permute.xlu1 %1913  ;;  %v3831_v22 = vpop.permute.xlu0 %1595  ;;  %v2052_v2 = vsel %vm954_vm7, %v2036_v60, %v3747_v29 }
 0x2cc   :  { %v1301_v59 = vsel %vm1269_vm4, %v1253_v33, %v1285_v1  ;;  %v2068_v45 = vsel %vm988_vm9, %v2052_v2, %v3762_v16 }
 0x2cd   :  { %1359 = vst.msk [vmem:[#allocation3 + $0x121] sm:$0xff] %vm886_vm2, %v1301_v59  ;;  %v1300_v47 = vsel %vm1268_vm6, %v1252_v19, %v1284_v46  ;;  %1803 = vrot.lane.b32.xlu1 %v1453_v54, %s2687_s2  ;;  %v2085_v24 = vsel %vm2081_vm15, %v2068_v45, %v3769_v41 }
 0x2ce   :  { %1358 = vst.msk [vmem:[#allocation3 + $0x111] sm:$0xff] %vm886_vm2, %v1300_v47  ;;  %1739 = vrot.lane.b32.xlu0 %v1390_v35, %s2683_s14 }
 0x2cf   :  { %v1978_v27 = vpop.permute.xlu1 %1977  ;;  %v1848_v37 = vpop.permute.xlu0 %1847 }
 0x2d0   :  { %v2102_v13 = vsel %vm2098_vm14, %v2085_v24, %v1848_v37 }
 0x2d1   :  { %1673 = vrot.lane.b32.xlu1 %v3840_v62, %s2681_s29 }
 0x2d2   :  { %1613 = vrot.lane.b32.xlu0 %v1453_v54, %s2679_s23 }
 0x2d3   :  { %v1658_v3 = vpop.permute.xlu1 %1657  ;;  %v1912_v4 = vpop.permute.xlu0 %1911 }
 0x2d4   :  { %v2053_v29 = vsel %vm954_vm7, %v2037_v50, %v1658_v3  ;;  %v2119_v19 = vsel %vm2115_vm0, %v2102_v13, %v1912_v4  ;;  %v1455_v3 = vld [vmem:[#allocation3 + $0x122] sm:$0xff]  ;;  %v2022_v50 = vsel %vm886_vm2, %v3665_v10, %v3823_v23  ;;  %v2023_v23 = vsel %vm886_vm2, %v3619_v44, %v3808_v56 }
 0x2d5   :  { %1737 = vrot.lane.b32.xlu1 %v1436_v5, %s2683_s14  ;;  %v3869_v59 = vld [vmem:[#allocation3 + $0x110] sm:$0xff] }
 0x2d6   :  { %1865 = vrot.lane.b32.xlu0 %v3826_v39, %s2684_s1  ;;  %v3879_v37 = vld [vmem:[#allocation3 + $0x111] sm:$0xff] }
 0x2d7   :  { %v1722_v8 = vpop.permute.xlu1 %1721  ;;  %v1786_v12 = vpop.permute.xlu0 %1785  ;;  %v3884_v2 = vld [vmem:[#allocation3 + $0x112] sm:$0xff] }
 0x2d8   :  { %v2069_v33 = vsel %vm988_vm9, %v2053_v29, %v1722_v8  ;;  %v1471_v8 = vld [vmem:[#allocation3 + $0x120] sm:$0xff] }
 0x2d9   :  { %1801 = vrot.lane.b32.xlu1 %v1452_v21, %s2687_s2  ;;  %v2086_v0 = vsel %vm2081_vm15, %v2069_v33, %v1786_v12  ;;  %v2038_v12 = vsel %vm920_vm5, %v2022_v50, %v3831_v22  ;;  %v2039_v22 = vsel %vm920_vm5, %v2023_v23, %v3814_v28  ;;  %v1488_v28 = vld [vmem:[#allocation3 + $0x131] sm:$0xff]  ;;  %v1457_v23 = vld [vmem:[#allocation3 + $0x20] sm:$0xff] }
 0x2da   :  { %1929 = vrot.lane.b32.xlu0 %v1390_v35, %s2685_s15  ;;  %v2103_v16 = vsel %vm2098_vm14, %v2086_v0, %v1850_v34  ;;  %v2054_v24 = vsel %vm954_vm7, %v2038_v12, %v3795_v58 }
 0x2db   :  { %v1976_v1 = vpop.permute.xlu1 %1975  ;;  %v1664_v46 = vpop.permute.xlu0 %1663  ;;  %v2120_v47 = vsel %vm2115_vm0, %v2103_v16, %v1914_v53 }
 0x2dc   :  { %v2136_v63 = vsel %vm2132_vm1, %v2119_v19, %v1976_v1  ;;  %v2137_v41 = vsel %vm2132_vm1, %v2120_v47, %v1978_v27 }
 0x2dd   :  { %1867 = vrot.lane.b32.xlu1 %v3869_v59, %s2684_s1  ;;  %2605 = vmatmul.mubr.msk.f32.vlgmr.msra.gmra.mrb[0].mxu1 %vm2158_vm3, %v2136_v63 }
 0x2de   :  { %1993 = vrot.lane.b32.xlu0 %v1453_v54, %s2686_s16  ;;  %2607 = vmatprep.mubr.msk.f32.mxu1 %vm2158_vm3, %v2137_v41 }
 0x2df   :  { %v1728_v34 = vpop.permute.xlu1 %1727  ;;  %v1792_v35 = vpop.permute.xlu0 %1791 }
 0x2e1   :  { %1931 = vrot.lane.b32.xlu1 %v3879_v37, %s2685_s15 }
 0x2e2   :  { %1547 = vrot.lane.b32.xlu0 %v1436_v5, %s2677_s0 }
 0x2e3   :  { %v1854_v53 = vpop.permute.xlu1 %1853  ;;  %v1536_v60 = vpop.permute.xlu0 %1535 }
 0x2e4   :  { %v2024_v4 = vsel %vm886_vm2, %v3691_v30, %v1536_v60  ;;  %v1472_v30 = vld [vmem:[#allocation3 + $0x130] sm:$0xff] }
 0x2e5   :  { %1995 = vrot.lane.b32.xlu1 %v3884_v2, %s2686_s16 }
 0x2e6   :  { %1611 = vrot.lane.b32.xlu0 %v1452_v21, %s2679_s23 }
 0x2e7   :  { %v1918_v54 = vpop.permute.xlu1 %1917  ;;  %v1600_v27 = vpop.permute.xlu0 %1599 }
 0x2e8   :  { %v2040_v57 = vsel %vm920_vm5, %v2024_v4, %v1600_v27  ;;  %v1504_v4 = vld [vmem:[#allocation3 + $0x132] sm:$0xff] }
 0x2e9   :  { %1807 = vrot.lane.b32.xlu1 %v1455_v3, %s2687_s2  ;;  %v2056_v33 = vsel %vm954_vm7, %v2040_v57, %v1664_v46  ;;  %v1487_v46 = vld [vmem:[#allocation3 + $0x121] sm:$0xff] }
 0x2ea   :  { %1863 = vrot.lane.b32.xlu0 %v3840_v62, %s2684_s1  ;;  %v2072_v10 = vsel %vm988_vm9, %v2056_v33, %v1728_v34 }
 0x2eb   :  { %v1982_v45 = vpop.permute.xlu1 %1981  ;;  %v1852_v29 = vpop.permute.xlu0 %1851  ;;  %v2089_v58 = vsel %vm2081_vm15, %v2072_v10, %v1792_v35 }
 0x2ec   :  { %v2106_v63 = vsel %vm2098_vm14, %v2089_v58, %v3722_v18  ;;  %v1473_v58 = vld [vmem:[#allocation3 + $0x21] sm:$0xff] }
 0x2ed   :  { %1869 = vrot.lane.b32.xlu1 %v1471_v8, %s2684_s1 }
 0x2ee   :  { %1927 = vrot.lane.b32.xlu0 %v1436_v5, %s2685_s15  ;;  %v2070_v5 = vsel %vm988_vm9, %v2054_v24, %v3806_v7 }
 0x2ef   :  { %v1662_v0 = vpop.permute.xlu1 %1661  ;;  %v1916_v13 = vpop.permute.xlu0 %1915  ;;  %v2087_v44 = vsel %vm2081_vm15, %v2070_v5, %v3816_v6 }
 0x2f0   :  { %v2055_v16 = vsel %vm954_vm7, %v2039_v22, %v1662_v0  ;;  %v2104_v7 = vsel %vm2098_vm14, %v2087_v44, %v1852_v29 }
 0x2f1   :  { %1871 = vrot.lane.b32.xlu1 %v1472_v30, %s2684_s1  ;;  %v2121_v41 = vsel %vm2115_vm0, %v2104_v7, %v1916_v13 }
 0x2f2   :  { %1991 = vrot.lane.b32.xlu0 %v1452_v21, %s2686_s16 }
 0x2f3   :  { %v1726_v19 = vpop.permute.xlu1 %1725  ;;  %v1790_v1 = vpop.permute.xlu0 %1789 }
 0x2f4   :  { %v2071_v47 = vsel %vm988_vm9, %v2055_v16, %v1726_v19 }
 0x2f5   :  { %1933 = vrot.lane.b32.xlu1 %v1487_v46, %s2685_s15  ;;  %v2088_v56 = vsel %vm2081_vm15, %v2071_v47, %v1790_v1  ;;  %v1489_v47 = vld [vmem:[#allocation3 + $0x22] sm:$0xff] }
 0x2f6   :  { %1679 = vrot.lane.b32.xlu0 %v1471_v8, %s2681_s29  ;;  %v2105_v21 = vsel %vm2098_vm14, %v2088_v56, %v1854_v53  ;;  %v2123_v53 = vsel %vm2115_vm0, %v2106_v63, %v3729_v48  ;;  %v1368_v8 = vld [vmem:[#allocation3 + $0xa0] sm:$0xff] }
 0x2f7   :  { %v1980_v34 = vpop.permute.xlu1 %1979  ;;  %v2122_v35 = vsel %vm2115_vm0, %v2105_v21, %v1918_v54  ;;  %v2140_v54 = vsel %vm2132_vm1, %v2123_v53, %v3683_v61  ;;  %v2025_v33 = vsel %vm886_vm2, %v1368_v8, %v3711_v42 }
 0x2f8   :  { %v2138_v60 = vsel %vm2132_vm1, %v2121_v41, %v1980_v34  ;;  %v2139_v6 = vsel %vm2132_vm1, %v2122_v35, %v1982_v45  ;;  %v2041_v24 = vsel %vm920_vm5, %v2025_v33, %v3679_v9 }
 0x2f9   :  { %1935 = vrot.lane.b32.xlu1 %v1488_v28, %s2685_s15  ;;  %2608 = vmatmul.mubr.msk.f32.gmra.mrb[2].mxu1 %vm2158_vm3, %v2138_v60 }
 0x2fa   :  { %1743 = vrot.lane.b32.xlu0 %v1487_v46, %s2683_s14  ;;  %2610 = vmatprep.mubr.msk.f32.mxu1 %vm2158_vm3, %v2139_v6 }
 0x2fb   :  { %v1732_v27 = vpop.permute.xlu1 %1731 }
 0x2fc   :  { %v1668_v18 = vpop.permute.xlu0 %1667 }
 0x2fd   :  { %1997 = vrot.lane.b32.xlu1 %v1455_v3, %s2686_s16  ;;  %2611 = vmatmul.mubr.msk.f32.gmra.mrb[4].mxu1 %vm2158_vm3, %v2140_v54 }
 0x2fe   :  { %1551 = vrot.lane.b32.xlu0 %v3879_v37, %s2677_s0 }
 0x2ff   :  { %v1606_v50 = vpop.permute.xlu1 %1605 }
 0x300   :  { %v1542_v57 = vpop.permute.xlu0 %1541 }
 0x301   :  { %1999 = vrot.lane.b32.xlu1 %v1504_v4, %s2686_s16 }
 0x302   :  { %1615 = vrot.lane.b32.xlu0 %v3884_v2, %s2679_s23 }
 0x303   :  { %v1858_v45 = vpop.permute.xlu1 %1857 }
 0x304   :  { %v1796_v48 = vpop.permute.xlu0 %1795 }
 0x306   :  { %1677 = vrot.lane.b32.xlu0 %v3869_v59, %s2681_s29 }
 0x307   :  { %v1922_v3 = vpop.permute.xlu1 %1921 }
 0x308   :  { %v1540_v61 = vpop.permute.xlu0 %1539 }
 0x309   :  { %v2026_v56 = vsel %vm886_vm2, %v3750_v55, %v1540_v61  ;;  %v2027_v55 = vsel %vm886_vm2, %v3718_v14, %v1542_v57 }
 0x30a   :  { %1741 = vrot.lane.b32.xlu0 %v3879_v37, %s2683_s14  ;;  %v2043_v4 = vsel %vm920_vm5, %v2027_v55, %v1606_v50 }
 0x30b   :  { %v1986_v29 = vpop.permute.xlu1 %1985 }
 0x30c   :  { %v1604_v12 = vpop.permute.xlu0 %1603 }
 0x30e   :  { %1805 = vrot.lane.b32.xlu0 %v3884_v2, %s2687_s2 }
 0x30f   :  { %v1666_v30 = vpop.permute.xlu1 %1665 }
 0x310   :  { %v2057_v0 = vsel %vm954_vm7, %v2041_v24, %v1666_v30  ;;  %v1794_v37 = vpop.permute.xlu0 %1793 }
 0x312   :  { %1779 = vrot.lane.b32.xlu0 %v3571_v20, %s2687_s2 }
 0x313   :  { %v1730_v13 = vpop.permute.xlu1 %1729 }
 0x314   :  { %v2073_v10 = vsel %vm988_vm9, %v2057_v0, %v1730_v13 }
 0x315   :  { %v2090_v2 = vsel %vm2081_vm15, %v2073_v10, %v1794_v37 }
 0x316   :  { %1841 = vrot.lane.b32.xlu0 %v1457_v23, %s2684_s1  ;;  %v2107_v42 = vsel %vm2098_vm14, %v2090_v2, %v1858_v45 }
 0x317   :  { %v2124_v22 = vsel %vm2115_vm0, %v2107_v42, %v1922_v3 }
 0x318   :  { %v2141_v20 = vsel %vm2132_vm1, %v2124_v22, %v1986_v29 }
 0x319   :  { %2613 = vmatprep.mubr.msk.f32.mxu1 %vm2158_vm3, %v2141_v20 }
 0x31a   :  { %1843 = vrot.lane.b32.xlu0 %v3594_v40, %s2684_s1 }
 0x31b   :  { %v1736_v9 = vpop.permute.xlu1 %1735 }
 0x31c   :  { %v1672_v5 = vpop.permute.xlu0 %1671 }
 0x31e   :  { %1905 = vrot.lane.b32.xlu0 %v1473_v58, %s2685_s15 }
 0x31f   :  { %v1610_v16 = vpop.permute.xlu1 %1609 }
 0x320   :  { %v1546_v19 = vpop.permute.xlu0 %1545 }
 0x322   :  { %1907 = vrot.lane.b32.xlu0 %v3599_v17, %s2685_s15  ;;  %v2042_v17 = vsel %vm920_vm5, %v2026_v56, %v1604_v12 }
 0x323   :  { %v1862_v1 = vpop.permute.xlu1 %1861  ;;  %v2058_v35 = vsel %vm954_vm7, %v2042_v17, %v1668_v18 }
 0x324   :  { %v3971_v46 = vpop.permute.xlu0 %1799  ;;  %v2074_v6 = vsel %vm988_vm9, %v2058_v35, %v1732_v27 }
 0x325   :  { %v2091_v54 = vsel %vm2081_vm15, %v2074_v6, %v1796_v48 }
 0x326   :  { %1969 = vrot.lane.b32.xlu0 %v1489_v47, %s2686_s16 }
 0x327   :  { %v1926_v44 = vpop.permute.xlu1 %1925 }
 0x328   :  { %v1544_v40 = vpop.permute.xlu0 %1543 }
 0x329   :  { %v2028_v28 = vsel %vm886_vm2, %v3797_v32, %v1544_v40 }
 0x32a   :  { %1971 = vrot.lane.b32.xlu0 %v3615_v43, %s2686_s16 }
 0x32b   :  { %v1990_v7 = vpop.permute.xlu1 %1989 }
 0x32c   :  { %v1608_v21 = vpop.permute.xlu0 %1607 }
 0x32d   :  { %v2044_v63 = vsel %vm920_vm5, %v2028_v28, %v1608_v21 }
 0x32e   :  { %v2060_v41 = vsel %vm954_vm7, %v2044_v63, %v1672_v5  ;;  %v2029_v5 = vsel %vm886_vm2, %v3764_v31, %v1546_v19 }
 0x32f   :  { %v2076_v34 = vsel %vm988_vm9, %v2060_v41, %v1736_v9  ;;  %v1670_v60 = vpop.permute.xlu1 %1669 }
 0x330   :  { %v1860_v43 = vpop.permute.xlu0 %1859  ;;  %v2059_v3 = vsel %vm954_vm7, %v2043_v4, %v1670_v60 }
 0x331   :  { %v2108_v45 = vsel %vm2098_vm14, %v2091_v54, %v1860_v43 }
 0x333   :  { %v1734_v32 = vpop.permute.xlu1 %1733 }
 0x334   :  { %v1924_v53 = vpop.permute.xlu0 %1923  ;;  %v2075_v29 = vsel %vm988_vm9, %v2059_v3, %v1734_v32 }
 0x335   :  { %v2125_v61 = vsel %vm2115_vm0, %v2108_v45, %v1924_v53 }
 0x337   :  { %v1988_v18 = vpop.permute.xlu1 %1987 }
 0x338   :  { %v2142_v27 = vsel %vm2132_vm1, %v2125_v61, %v1988_v18  ;;  %v1798_v8 = vpop.permute.xlu0 %1797 }
 0x339   :  { %v2092_v14 = vsel %vm2081_vm15, %v2075_v29, %v1798_v8  ;;  %2614 = vmatmul.mubr.msk.f32.gmra.mrb[6].mxu1 %vm2158_vm3, %v2142_v27 }
 0x33a   :  { %v2109_v57 = vsel %vm2098_vm14, %v2092_v14, %v1862_v1 }
 0x33b   :  { %v1550_v48 = vpop.permute.xlu1 %1549  ;;  %v2126_v50 = vsel %vm2115_vm0, %v2109_v57, %v1926_v44  ;;  %v2045_v44 = vsel %vm920_vm5, %v2029_v5, %v1610_v16  ;;  %v2093_v16 = vsel %vm2081_vm15, %v2076_v34, %v3971_v46 }
 0x33c   :  { %v1676_v12 = vpop.permute.xlu0 %1675  ;;  %v2143_v33 = vsel %vm2132_vm1, %v2126_v50, %v1990_v7 }
 0x33d   :  { %2616 = vmatprep.mubr.msk.f32.mxu1 %vm2158_vm3, %v2143_v33 }
 0x33f   :  { %v1804_v30 = vpop.permute.xlu1 %1803 }
 0x340   :  { %v1740_v24 = vpop.permute.xlu0 %1739 }
 0x343   :  { %v1674_v0 = vpop.permute.xlu1 %1673 }
 0x344   :  { %v1614_v13 = vpop.permute.xlu0 %1613  ;;  %v2061_v28 = vsel %vm954_vm7, %v2045_v44, %v1674_v0 }
 0x347   :  { %v1738_v37 = vpop.permute.xlu1 %1737 }
 0x348   :  { %v1866_v10 = vpop.permute.xlu0 %1865  ;;  %v2077_v7 = vsel %vm988_vm9, %v2061_v28, %v1738_v37  ;;  %v2673_v28 = vld [vmem:[#allocation3 + $0x10] sm:$0xff] }
 0x34b   :  { %v1802_v23 = vpop.permute.xlu1 %1801 }
 0x34c   :  { %v1930_v2 = vpop.permute.xlu0 %1929  ;;  %v2094_v17 = vsel %vm2081_vm15, %v2077_v7, %v1802_v23  ;;  %v2018_v7 = vsel %vm886_vm2, %v2673_v28, %v3713_v15 }
 0x34d   :  { %v2111_v19 = vsel %vm2098_vm14, %v2094_v17, %v1866_v10 }
 0x34e   :  { %v2128_v35 = vsel %vm2115_vm0, %v2111_v19, %v1930_v2 }
 0x34f   :  { %v1868_v42 = vpop.permute.xlu1 %1867 }
 0x350   :  { %v1994_v22 = vpop.permute.xlu0 %1993 }
 0x351   :  { %v2145_v53 = vsel %vm2132_vm1, %v2128_v35, %v1994_v22  ;;  %v4077_v35 = vld [vmem:[%s4185_s5] ss:$0 sm:$0xff] }
 0x353   :  { %v1932_v20 = vpop.permute.xlu1 %1931 }
 0x354   :  { %v1548_v9 = vpop.permute.xlu0 %1547 }
 0x355   :  { %v2030_v58 = vsel %vm886_vm2, %v3840_v62, %v1548_v9 }
 0x357   :  { %v1996_v40 = vpop.permute.xlu1 %1995 }
 0x358   :  { %v1612_v1 = vpop.permute.xlu0 %1611 }
 0x359   :  { %v2046_v47 = vsel %vm920_vm5, %v2030_v58, %v1612_v1  ;;  %v1360_v1 = vld [vmem:[#allocation3] sm:$0xff] }
 0x35a   :  { %v2062_v56 = vsel %vm954_vm7, %v2046_v47, %v1676_v12  ;;  %v2017_v44 = vsel %vm886_vm2, %v1360_v1, %v3737_v51 }
 0x35b   :  { %v2078_v31 = vsel %vm988_vm9, %v2062_v56, %v1740_v24  ;;  %v1808_v63 = vpop.permute.xlu1 %1807  ;;  %v2031_v24 = vsel %vm886_vm2, %v3826_v39, %v1550_v48  ;;  %v2033_v56 = vsel %vm920_vm5, %v2017_v44, %v3689_v26 }
 0x35c   :  { %v1864_v21 = vpop.permute.xlu0 %1863  ;;  %v2095_v62 = vsel %vm2081_vm15, %v2078_v31, %v1804_v30  ;;  %v2047_v0 = vsel %vm920_vm5, %v2031_v24, %v1614_v13  ;;  %v2049_v17 = vsel %vm954_vm7, %v2033_v56, %v3725_v25 }
 0x35d   :  { %v2110_v60 = vsel %vm2098_vm14, %v2093_v16, %v1864_v21  ;;  %v2112_v43 = vsel %vm2098_vm14, %v2095_v62, %v1868_v42  ;;  %v2034_v21 = vsel %vm920_vm5, %v2018_v7, %v3716_v36  ;;  %v2065_v19 = vsel %vm988_vm9, %v2049_v17, %v3732_v49 }
 0x35e   :  { %v2129_v4 = vsel %vm2115_vm0, %v2112_v43, %v1932_v20  ;;  %v2050_v51 = vsel %vm954_vm7, %v2034_v21, %v3699_v11  ;;  %v2082_v26 = vsel %vm2081_vm15, %v2065_v19, %v3740_v52 }
 0x35f   :  { %v1870_v54 = vpop.permute.xlu1 %1869  ;;  %v2146_v34 = vsel %vm2132_vm1, %v2129_v4, %v1996_v40  ;;  %v2066_v36 = vsel %vm988_vm9, %v2050_v51, %v3705_v38 }
 0x360   :  { %v1928_v41 = vpop.permute.xlu0 %1927 }
 0x361   :  { %v2127_v6 = vsel %vm2115_vm0, %v2110_v60, %v1928_v41  ;;  %v4082_v60 = vld [vmem:[%s4186_s6] ss:$0 sm:$0xff] }
 0x363   :  { %v1872_v45 = vpop.permute.xlu1 %1871 }
 0x364   :  { %v1992_v55 = vpop.permute.xlu0 %1991 }
 0x365   :  { %v2144_v32 = vsel %vm2132_vm1, %v2127_v6, %v1992_v55 }
 0x366   :  { %2617 = vmatmul.mubr.msk.f32.gmra.mrb[8].mxu1 %vm2158_vm3, %v2144_v32 }
 0x367   :  { %2619 = vmatprep.mubr.msk.f32.mxu1 %vm2158_vm3, %v2145_v53  ;;  %v1934_v18 = vpop.permute.xlu1 %1933 }
 0x368   :  { %v1680_v46 = vpop.permute.xlu0 %1679 }
 0x36a   :  { %2620 = vmatmul.mubr.msk.f32.gmra.mrb[10].mxu1 %vm2158_vm3, %v2146_v34 }
 0x36b   :  { %v1936_v57 = vpop.permute.xlu1 %1935 }
 0x36c   :  { %v1744_v3 = vpop.permute.xlu0 %1743 }
 0x36f   :  { %v1998_v37 = vpop.permute.xlu1 %1997 }
 0x370   :  { %v1552_v61 = vpop.permute.xlu0 %1551 }
 0x371   :  { %v2032_v29 = vsel %vm886_vm2, %v3869_v59, %v1552_v61 }
 0x373   :  { %v2000_v22 = vpop.permute.xlu1 %1999 }
 0x374   :  { %v1616_v27 = vpop.permute.xlu0 %1615 }
 0x375   :  { %v2048_v8 = vsel %vm920_vm5, %v2032_v29, %v1616_v27 }
 0x376   :  { %v2064_v14 = vsel %vm954_vm7, %v2048_v8, %v1680_v46 }
 0x377   :  { %v2080_v12 = vsel %vm988_vm9, %v2064_v14, %v1744_v3 }
 0x378   :  { %v1678_v50 = vpop.permute.xlu0 %1677  ;;  %v2097_v33 = vsel %vm2081_vm15, %v2080_v12, %v1808_v63 }
 0x379   :  { %v2063_v59 = vsel %vm954_vm7, %v2047_v0, %v1678_v50  ;;  %v2114_v10 = vsel %vm2098_vm14, %v2097_v33, %v1872_v45 }
 0x37a   :  { %v2131_v20 = vsel %vm2115_vm0, %v2114_v10, %v1936_v57 }
 0x37b   :  { %v2148_v13 = vsel %vm2132_vm1, %v2131_v20, %v2000_v22 }
 0x37c   :  { %v1742_v30 = vpop.permute.xlu0 %1741 }
 0x37d   :  { %v2079_v23 = vsel %vm988_vm9, %v2063_v59, %v1742_v30 }
 0x380   :  { %v1806_v2 = vpop.permute.xlu0 %1805 }
 0x381   :  { %v2096_v42 = vsel %vm2081_vm15, %v2079_v23, %v1806_v2 }
 0x382   :  { %v2113_v9 = vsel %vm2098_vm14, %v2096_v42, %v1870_v54 }
 0x383   :  { %v2130_v5 = vsel %vm2115_vm0, %v2113_v9, %v1934_v18 }
 0x384   :  { %v1780_v39 = vpop.permute.xlu0 %1779  ;;  %v2147_v48 = vsel %vm2132_vm1, %v2130_v5, %v1998_v37 }
 0x385   :  { %2622 = vmatprep.mubr.msk.f32.mxu1 %vm2158_vm3, %v2147_v48  ;;  %v2083_v41 = vsel %vm2081_vm15, %v2066_v36, %v1780_v39 }
 0x386   :  { %2623 = vmatmul.mubr.msk.f32.gmra.mrb[12].mxu1 %vm2158_vm3, %v2148_v13 }
 0x388   :  { %v1842_v58 = vpop.permute.xlu0 %1841 }
 0x389   :  { %v2099_v62 = vsel %vm2098_vm14, %v2082_v26, %v1842_v58 }
 0x38c   :  { %v1844_v47 = vpop.permute.xlu0 %1843 }
 0x38d   :  { %v2100_v49 = vsel %vm2098_vm14, %v2083_v41, %v1844_v47 }
 0x390   :  { %v1906_v40 = vpop.permute.xlu0 %1905 }
 0x391   :  { %v2116_v15 = vsel %vm2115_vm0, %v2099_v62, %v1906_v40 }
 0x394   :  { %v1908_v31 = vpop.permute.xlu0 %1907 }
 0x395   :  { %v2117_v11 = vsel %vm2115_vm0, %v2100_v49, %v1908_v31 }
 0x398   :  { %v1970_v63 = vpop.permute.xlu0 %1969 }
 0x399   :  { %v2133_v25 = vsel %vm2132_vm1, %v2116_v15, %v1970_v63 }
 0x39a   :  { %2601 = vmatprep.mubr.msk.f32.mxu0 %vm2158_vm3, %v2133_v25 }
 0x39c   :  { %v1972_v16 = vpop.permute.xlu0 %1971 }
 0x39d   :  { %v2134_v52 = vsel %vm2132_vm1, %v2117_v11, %v1972_v16 }
 0x39e   :  { %2602 = vmatmul.mubr.msk.f32.vlgmr.msra.gmra.mrb[16].mxu0 %vm2158_vm3, %v2134_v52 }
 0x3b0   :  { %v2606_v38 = vpop.f32.mrb[0].mxu1 }
 0x3b1   :  { %v2362_v43 = vmul.f32 %v2606_v38, %v4077_v35  ;;  %v2283_v6 = vpop.f32.mrb[1].mxu1 }
 0x3b2   :  { %v2361_v55 = vmul.f32 %v4077_v35, %v2283_v6 }
 0x3b3   :  { %v2385_v32 = vadd.f32 %v4082_v60, %v2362_v43 }
 0x3b4   :  { %v2384_v53 = vadd.f32 %v4082_v60, %v2361_v55 }
 0x3b5   :  { %vm2401_vm5 = vcmp.gt.f32.partialorder %v2385_v32, 0.0  ;;  %v2417_v54 = vmul.f32 0.01, %v2385_v32 }
 0x3b6   :  { %vm2400_vm7 = vcmp.gt.f32.partialorder %v2384_v53, 0.0  ;;  %v2416_v4 = vmul.f32 0.01, %v2384_v53 }
 0x3b7   :  { %v2433_v46 = vsel %vm2401_vm5, %v2385_v32, %v2417_v54 }
 0x3b8   :  { %2449 = vst.msk [vmem:[%s4187_s7 + $0x18] sm:$0xff] %vm886_vm2, %v2433_v46  ;;  %v2432_v34 = vsel %vm2400_vm7, %v2384_v53, %v2416_v4 }
 0x3b9   :  { %2448 = vst.msk [vmem:[%s4187_s7 + $0x10] sm:$0xff] %vm886_vm2, %v2432_v34 }
 0x3cc   :  { %v2609_v45 = vpop.f32.mrb[2].mxu1 }
 0x3cd   :  { %v2364_v3 = vmul.f32 %v2609_v45, %v4077_v35  ;;  %v2293_v61 = vpop.f32.mrb[3].mxu1 }
 0x3ce   :  { %v2363_v18 = vmul.f32 %v4077_v35, %v2293_v61 }
 0x3cf   :  { %v2387_v29 = vadd.f32 %v4082_v60, %v2364_v3 }
 0x3d0   :  { %v2386_v27 = vadd.f32 %v4082_v60, %v2363_v18  ;;  %v2612_v8 = vpop.f32.mrb[4].mxu1 }
 0x3d1   :  { %vm2403_vm9 = vcmp.gt.f32.partialorder %v2387_v29, 0.0  ;;  %v2419_v14 = vmul.f32 0.01, %v2387_v29  ;;  %v2366_v57 = vmul.f32 %v2612_v8, %v4077_v35  ;;  %v2303_v50 = vpop.f32.mrb[5].mxu1 }
 0x3d2   :  { %vm2402_vm8 = vcmp.gt.f32.partialorder %v2386_v27, 0.0  ;;  %v2418_v12 = vmul.f32 0.01, %v2386_v27  ;;  %v2365_v33 = vmul.f32 %v4077_v35, %v2303_v50 }
 0x3d3   :  { %v2435_v30 = vsel %vm2403_vm9, %v2387_v29, %v2419_v14  ;;  %v2389_v24 = vadd.f32 %v4082_v60, %v2366_v57 }
 0x3d4   :  { %2451 = vst.msk [vmem:[%s4187_s7 + $0x28] sm:$0xff] %vm886_vm2, %v2435_v30  ;;  %v2434_v0 = vsel %vm2402_vm8, %v2386_v27, %v2418_v12  ;;  %v2388_v37 = vadd.f32 %v4082_v60, %v2365_v33 }
 0x3d5   :  { %2450 = vst.msk [vmem:[%s4187_s7 + $0x20] sm:$0xff] %vm886_vm2, %v2434_v0  ;;  %vm2405_vm10 = vcmp.gt.f32.partialorder %v2389_v24, 0.0  ;;  %v2421_v59 = vmul.f32 0.01, %v2389_v24 }
 0x3d6   :  { %vm2404_vm11 = vcmp.gt.f32.partialorder %v2388_v37, 0.0  ;;  %v2420_v10 = vmul.f32 0.01, %v2388_v37 }
 0x3d7   :  { %v2437_v23 = vsel %vm2405_vm10, %v2389_v24, %v2421_v59 }
 0x3d8   :  { %2453 = vst.msk [vmem:[%s4187_s7 + $0x38] sm:$0xff] %vm886_vm2, %v2437_v23  ;;  %v2436_v2 = vsel %vm2404_vm11, %v2388_v37, %v2420_v10 }
 0x3d9   :  { %2452 = vst.msk [vmem:[%s4187_s7 + $0x30] sm:$0xff] %vm886_vm2, %v2436_v2 }
 0x40c   :  { %v2615_v42 = vpop.f32.mrb[6].mxu1 }
 0x40d   :  { %v2368_v22 = vmul.f32 %v2615_v42, %v4077_v35  ;;  %v2313_v20 = vpop.f32.mrb[7].mxu1 }
 0x40e   :  { %v2367_v9 = vmul.f32 %v4077_v35, %v2313_v20 }
 0x40f   :  { %v2391_v5 = vadd.f32 %v4082_v60, %v2368_v22 }
 0x410   :  { %v2390_v39 = vadd.f32 %v4082_v60, %v2367_v9 }
 0x411   :  { %vm2407_vm12 = vcmp.gt.f32.partialorder %v2391_v5, 0.0  ;;  %v2423_v48 = vmul.f32 0.01, %v2391_v5 }
 0x412   :  { %vm2406_vm13 = vcmp.gt.f32.partialorder %v2390_v39, 0.0  ;;  %v2422_v13 = vmul.f32 0.01, %v2390_v39 }
 0x413   :  { %v2439_v58 = vsel %vm2407_vm12, %v2391_v5, %v2423_v48 }
 0x414   :  { %2455 = vst.msk [vmem:[%s4187_s7 + $0x48] sm:$0xff] %vm886_vm2, %v2439_v58  ;;  %v2438_v1 = vsel %vm2406_vm13, %v2390_v39, %v2422_v13 }
 0x415   :  { %2454 = vst.msk [vmem:[%s4187_s7 + $0x40] sm:$0xff] %vm886_vm2, %v2438_v1 }
 0x439   :  { %v2618_v47 = vpop.f32.mrb[8].mxu1 }
 0x43a   :  { %v2370_v44 = vmul.f32 %v2618_v47, %v4077_v35  ;;  %v2323_v40 = vpop.f32.mrb[9].mxu1 }
 0x43b   :  { %v2369_v56 = vmul.f32 %v4077_v35, %v2323_v40 }
 0x43c   :  { %v2393_v28 = vadd.f32 %v4082_v60, %v2370_v44 }
 0x43d   :  { %v2392_v7 = vadd.f32 %v4082_v60, %v2369_v56  ;;  %v2621_v21 = vpop.f32.mrb[10].mxu1 }
 0x43e   :  { %vm2409_vm14 = vcmp.gt.f32.partialorder %v2393_v28, 0.0  ;;  %v2425_v17 = vmul.f32 0.01, %v2393_v28  ;;  %v2372_v31 = vmul.f32 %v2621_v21, %v4077_v35  ;;  %v2333_v19 = vpop.f32.mrb[11].mxu1 }
 0x43f   :  { %vm2408_vm15 = vcmp.gt.f32.partialorder %v2392_v7, 0.0  ;;  %v2424_v51 = vmul.f32 0.01, %v2392_v7  ;;  %v2371_v26 = vmul.f32 %v4077_v35, %v2333_v19 }
 0x440   :  { %v2441_v62 = vsel %vm2409_vm14, %v2393_v28, %v2425_v17  ;;  %v2395_v15 = vadd.f32 %v4082_v60, %v2372_v31 }
 0x441   :  { %2457 = vst.msk [vmem:[%s4187_s7 + $0x58] sm:$0xff] %vm886_vm2, %v2441_v62  ;;  %v2440_v63 = vsel %vm2408_vm15, %v2392_v7, %v2424_v51  ;;  %v2394_v36 = vadd.f32 %v4082_v60, %v2371_v26 }
 0x442   :  { %2456 = vst.msk [vmem:[%s4187_s7 + $0x50] sm:$0xff] %vm886_vm2, %v2440_v63  ;;  %vm2411_vm0 = vcmp.gt.f32.partialorder %v2395_v15, 0.0  ;;  %v2427_v25 = vmul.f32 0.01, %v2395_v15 }
 0x443   :  { %vm2410_vm1 = vcmp.gt.f32.partialorder %v2394_v36, 0.0  ;;  %v2426_v41 = vmul.f32 0.01, %v2394_v36 }
 0x444   :  { %v2443_v49 = vsel %vm2411_vm0, %v2395_v15, %v2427_v25 }
 0x445   :  { %2459 = vst.msk [vmem:[%s4187_s7 + $0x68] sm:$0xff] %vm886_vm2, %v2443_v49  ;;  %v2442_v11 = vsel %vm2410_vm1, %v2394_v36, %v2426_v41 }
 0x446   :  { %2458 = vst.msk [vmem:[%s4187_s7 + $0x60] sm:$0xff] %vm886_vm2, %v2442_v11 }
 0x459   :  { %v2624_v16 = vpop.f32.mrb[12].mxu1 }
 0x45a   :  { %v2374_v52 = vmul.f32 %v2624_v16, %v4077_v35  ;;  %v2343_v38 = vpop.f32.mrb[13].mxu1 }
 0x45b   :  { %v2373_v43 = vmul.f32 %v4077_v35, %v2343_v38 }
 0x45c   :  { %v2397_v6 = vadd.f32 %v4082_v60, %v2374_v52 }
 0x45d   :  { %v2396_v55 = vadd.f32 %v4082_v60, %v2373_v43 }
 0x45e   :  { %vm2413_vm3 = vcmp.gt.f32.partialorder %v2397_v6, 0.0  ;;  %v2429_v32 = vmul.f32 0.01, %v2397_v6 }
 0x45f   :  { %vm2412_vm4 = vcmp.gt.f32.partialorder %v2396_v55, 0.0  ;;  %v2428_v53 = vmul.f32 0.01, %v2396_v55 }
 0x460   :  { %v2445_v54 = vsel %vm2413_vm3, %v2397_v6, %v2429_v32 }
 0x461   :  { %2461 = vst.msk [vmem:[%s4187_s7 + $0x78] sm:$0xff] %vm886_vm2, %v2445_v54  ;;  %v2444_v4 = vsel %vm2412_vm4, %v2396_v55, %v2428_v53 }
 0x462   :  { %2460 = vst.msk [vmem:[%s4187_s7 + $0x70] sm:$0xff] %vm886_vm2, %v2444_v4 }
 0x471   :  { %v2603_v46 = vpop.f32.mrb[16].mxu0 }
 0x472   :  { %v2360_v34 = vmul.f32 %v2603_v46, %v4077_v35  ;;  %v2273_v45 = vpop.f32.mrb[17].mxu0 }
 0x473   :  { %v2359_v3 = vmul.f32 %v4077_v35, %v2273_v45 }
 0x474   :  { %v2383_v61 = vadd.f32 %v4082_v60, %v2360_v34 }
 0x475   :  { %v2382_v18 = vadd.f32 %v4082_v60, %v2359_v3 }
 0x476   :  { %vm2399_vm6 = vcmp.gt.f32.partialorder %v2383_v61, 0.0  ;;  %v2415_v29 = vmul.f32 0.01, %v2383_v61 }
 0x477   :  { %vm2398_vm5 = vcmp.gt.f32.partialorder %v2382_v18, 0.0  ;;  %v2414_v27 = vmul.f32 0.01, %v2382_v18 }
 0x478   :  { %v2431_v8 = vsel %vm2399_vm6, %v2383_v61, %v2415_v29 }
 0x479   :  { %2447 = vst.msk [vmem:[%s4187_s7 + $0x8] sm:$0xff] %vm886_vm2, %v2431_v8  ;;  %v2430_v14 = vsel %vm2398_vm5, %v2382_v18, %v2414_v27 }
 0x47a   :  { %2446 = vst.msk [vmem:[%s4187_s7] sm:$0xff] %vm886_vm2, %v2430_v14 }

</bundles_post_ra>
